<compile_context>
chip_gen: v6e
topology: v6e:2x2x1
jax: 0.10.0
libtpu: 0.0.40
codegen_flags: <defaults>
</compile_context>

<pallas_src>
import functools

import jax
import jax.numpy as jnp
from jax import lax
from jax.experimental import pallas as pl
from jax.experimental.pallas import tpu as pltpu

EPS = 1e-9       # matches the reference module
IN_EPS = 1e-5    # nn.InstanceNorm1d default eps


# ----------------------------- in-kernel helpers -----------------------------

def _reflect_pad_time(x, k):
    """pad_input(): reflect padding along time (axis 1) of a (nb, t, c) tile."""
    if k <= 1:
        return x
    t = x.shape[1]
    lo = k // 2
    hi = k // 2 if (k % 2) else (k // 2 - 1)
    parts = [x[:, i:i + 1, :] for i in range(lo, 0, -1)]
    parts.append(x)
    parts += [x[:, t - 2 - i:t - 1 - i, :] for i in range(hi)]
    return jnp.concatenate(parts, axis=1)


def _instance_norm(x):
    """nn.InstanceNorm1d(affine=False): per (sample, channel) over time, biased variance."""
    mean = jnp.mean(x, axis=1, keepdims=True)
    var = jnp.mean(jnp.square(x - mean), axis=1, keepdims=True)
    return (x - mean) * lax.rsqrt(var + IN_EPS)


def _decimate_rows(y, s, stage):
    """Rows 0, s, 2s, ... of each sample: (nb, t, c) -> (nb, ceil(t/s), c).

    One contiguous VMEM store + strided sublane read(s); replaces the previous staged-input
    im2col (k strided reads per strided conv).
    """
    if s <= 1:
        return y
    nb, t, c = y.shape
    n_out = -(-t // s)
    stage[0:nb * t, 0:c] = y.reshape(nb * t, c)
    if t % s == 0:
        # sample boundaries are stride-aligned: one strided read covers the whole block
        return stage[pl.ds(0, nb * n_out, s), 0:c].reshape(nb, n_out, c)
    parts = [stage[pl.ds(b * t, n_out, s), 0:c].reshape(1, n_out, c) for b in range(nb)]
    return jnp.concatenate(parts, axis=0)


def _avg_pool_ceil(x, pool, stage):
    """F.avg_pool1d(kernel_size=pool, ceil_mode=True, padding=0) per sample.

    PyTorch divides the clipped last window by the number of valid elements; implemented
    with reciprocal-count multiplies (no vector divide).
    """
    if pool <= 1:
        return x
    nb, t, c = x.shape
    n_out = -(-t // pool)
    rem = t - (n_out - 1) * pool          # valid elements in the last window (1..pool)
    stage[0:nb * t, 0:c] = x.reshape(nb * t, c)

    def phase(r):
        if t % pool == 0:
            p = stage[pl.ds(r, nb * n_out, pool), 0:c].reshape(nb, n_out, c)
        else:
            p = jnp.concatenate(
                [stage[pl.ds(b * t + r, n_out, pool), 0:c].reshape(1, n_out, c)
                 for b in range(nb)], axis=0)
        if r >= rem:                       # this phase's last row lies past the sample end
            row = lax.broadcasted_iota(jnp.int32, (1, n_out, 1), 1)
            p = jnp.where(row == n_out - 1, 0.0, p)
        return p

    acc = phase(0)
    for r in range(1, pool):
        acc = acc + phase(r)
    if rem == pool:
        return acc * (1.0 / pool)
    row = lax.broadcasted_iota(jnp.int32, (1, n_out, 1), 1)
    return acc * jnp.where(row == n_out - 1, 1.0 / rem, 1.0 / pool)


def _conv1d(x, w_ref, b_ref, stage, *, stride=1):
    """nn.Conv1d over reflect-padded input (pad_input), per sample, f32 operands.

    x: (nb, t, c_in).  w_ref: (k, c_in, c_out) Ref.  b_ref: (1, c_out) Ref.
    Tap-accumulated MXU matmuls (no im2col lane concat); stride>1 decimates the stride-1
    result.  Returns (nb, ceil(t/stride), c_out) f32.
    """
    k, c_in, c_out = w_ref.shape
    nb, t, _ = x.shape
    xp = _reflect_pad_time(x, k)                       # (nb, t + k - 1, c_in)
    acc = None
    for j in range(k):
        tap = xp[:, j:j + t, :] if k > 1 else xp
        yj = jnp.dot(tap.reshape(nb * t, c_in), w_ref[j],
                     preferred_element_type=jnp.float32)
        acc = yj if acc is None else acc + yj
    y = (acc + b_ref[...]).reshape(nb, t, c_out)
    return _decimate_rows(y, stride, stage)


# --------------------------------- the kernel ---------------------------------

def _encoder_kernel(*refs, n_blocks, stride_list):
    x_ref, w_in, b_in = refs[0], refs[1], refs[2]
    blk = refs[3:3 + 6 * n_blocks]
    w_mlv, b_mlv, out_ref, stage = refs[3 + 6 * n_blocks:]

    x = jnp.log(x_ref[...].astype(jnp.float32) + EPS)

    # input_layer (1x1) -> InstanceNorm -> ReLU.
    # TODO(synk): nn.Dropout is identity at inference; activation assumed nn.ReLU()
    # (the module eval()s a user-provided string) — other activations not implemented.
    out = _conv1d(x, w_in, b_in, stage)
    out = jnp.maximum(_instance_norm(out), 0.0)

    for i in range(n_blocks):
        w1, b1, w2, b2, wd, bd = blk[6 * i:6 * (i + 1)]
        s = stride_list[i]
        y = _conv1d(out, w1, b1, stage)
        y = jnp.maximum(_instance_norm(y), 0.0)
        y = _conv1d(y, w2, b2, stage, stride=s)
        y = jnp.maximum(_instance_norm(y), 0.0)
        out = _conv1d(out, wd, bd, stage)
        out = _avg_pool_ceil(out, s, stage)
        out = out + y

    # fused affine_mu / affine_logvar: one 1x1 conv into a single lane-wider slab;
    # the wrapper splits mu / logvar (single store region, no in-kernel lane slicing).
    out_ref[...] = _conv1d(out, w_mlv, b_mlv, stage).astype(out_ref.dtype)


# --------------------------------- the wrapper ---------------------------------

def _const_spec(shape):
    if len(shape) == 2:
        return pl.BlockSpec(shape, lambda i: (0, 0))
    return pl.BlockSpec(shape, lambda i: (0, 0, 0))


def content_encoder_forward(x_nct, params, *, n_blocks, kernel_size, stride_list,
                            batch_block=None):
    """x_nct: (B, C_in, T) like the PyTorch module. Returns (mu, log_var) as (B, C_out, T_out)."""
    del kernel_size  # implied by the weight shapes
    B, c_in, T = x_nct.shape
    c_out = params["mu"][0].shape[2]

    x = jnp.transpose(x_nct, (0, 2, 1)).astype(jnp.float32)   # NCT -> NTC

    # Batch blocking: NB samples per grid step (stacked on the sublane/M axis) to fill the
    # MXU and amortize per-step overhead, while keeping >= 2 grid steps so v7x's two
    # TensorCores both receive work on the "parallel" batch axis.
    if batch_block is None:
        nb = 1 if B <= 1 else min(8, max(1, B // 2))
    else:
        nb = max(1, min(batch_block, B))
    Bp = -(-B // nb) * nb
    if Bp != B:
        x = jnp.concatenate([x, jnp.ones((Bp - B, T, c_in), x.dtype)], axis=0)

    args = [x]
    in_specs = [pl.BlockSpec((nb, T, c_in), lambda i: (i, 0, 0))]

    def add_layer(w, b):
        w = jnp.asarray(w, jnp.float32)
        b = jnp.asarray(b, jnp.float32)
        args.extend([w, b])
        in_specs.extend([_const_spec(w.shape), _const_spec(b.shape)])

    add_layer(*params["input"])
    for i in range(n_blocks):
        add_layer(*params["first"][i])
        add_layer(*params["second"][i])
        add_layer(*params["dimred"][i])

    # mu / logvar fused into a single (1, c_h[-1], 2*c_out) conv -> one lane-wider output.
    add_layer(jnp.concatenate([params["mu"][0], params["logvar"][0]], axis=2),
              jnp.concatenate([params["mu"][1], params["logvar"][1]], axis=1))

    # Output time length + sizing of the row-decimation scratch (only strided convs and
    # the ceil-mode avg-pool touch it; stride-1 layers never do).
    t_cur, rows, cols = T, 8, 8
    for i in range(n_blocks):
        s = stride_list[i]
        if s > 1:
            rows = max(rows, nb * t_cur)
            cols = max(cols, params["first"][i][0].shape[2])
        t_cur = -(-t_cur // s)
    t_f = t_cur
    slack = 8 + max([1] + list(stride_list))
    rows = -(-(rows + slack) // 8) * 8

    # VMEM budget derived from T and NB (whole-sample residency, 128-lane padding of the
    # narrow f32 activations), clamped to stay inside v7x's 64 MiB physical VMEM.
    act_bytes = nb * (-(-T // 8) * 8) * 128 * 4
    vmem_limit = int(min(48 << 20, max(32 << 20, 40 * act_bytes + (2 << 20))))
    # TODO(synk): for very long T this whole-sample-resident kernel should tile the time
    # axis with a (kernel_size-1) halo and a two-pass instance norm.

    kernel = functools.partial(_encoder_kernel, n_blocks=n_blocks,
                               stride_list=tuple(stride_list))

    mlv = pl.pallas_call(
        kernel,
        out_shape=jax.ShapeDtypeStruct((Bp, t_f, 2 * c_out), jnp.float32),
        grid=(Bp // nb,),
        in_specs=in_specs,
        out_specs=pl.BlockSpec((nb, t_f, 2 * c_out), lambda i: (i, 0, 0)),
        scratch_shapes=[pltpu.VMEM((rows, cols), jnp.float32)],
        compiler_params=pltpu.CompilerParams(
            dimension_semantics=("parallel",),
            vmem_limit_bytes=vmem_limit,
        ),
    )(*args)

    mu = jnp.transpose(mlv[:B, :, :c_out], (0, 2, 1))
    log_var = jnp.transpose(mlv[:B, :, c_out:], (0, 2, 1))
    return mu, log_var


def init_params(key, c_in, c_out, c_h, n_blocks, kernel_size):
    """Deterministic synthetic parameters (shapes mirror the PyTorch module)."""
    def conv_params(k_, ksz, cin, cout):
        kw, kb = jax.random.split(k_)
        w = 0.1 * jax.random.normal(kw, (ksz, cin, cout), jnp.float32)
        b = 0.1 * jax.random.normal(kb, (1, cout), jnp.float32)
        return w, b

    keys = jax.random.split(key, 3 + 3 * n_blocks)
    return {
        "input": conv_params(keys[0], 1, c_in, c_h[0]),
        "first": [conv_params(keys[1 + i], kernel_size, c_h[i], c_h[i + 1])
                  for i in range(n_blocks)],
        "second": [conv_params(keys[1 + n_blocks + i], kernel_size, c_h[i + 1], c_h[i + 1])
                   for i in range(n_blocks)],
        "dimred": [conv_params(keys[1 + 2 * n_blocks + i], 1, c_h[i], c_h[i + 1])
                   for i in range(n_blocks)],
        "mu": conv_params(keys[1 + 3 * n_blocks], 1, c_h[-1], c_out),
        "logvar": conv_params(keys[2 + 3 * n_blocks], 1, c_h[-1], c_out),
    }


if __name__ == "__main__":
    key = jax.random.PRNGKey(0)
    kx, kp = jax.random.split(key)

    # small config consistent with the module's __init__
    B, C_IN, T = 2, 4, 16
    C_OUT = 4
    C_H = [8, 16, 16]           # length n_conv_blocks + 1
    N_BLOCKS = 2
    KSIZE = 3
    STRIDES = [1, 2]

    x = jax.random.uniform(kx, (B, C_IN, T), jnp.float32, minval=0.01, maxval=1.0)
    params = init_params(kp, C_IN, C_OUT, C_H, N_BLOCKS, KSIZE)

    mu, log_var = content_encoder_forward(x, params, n_blocks=N_BLOCKS,
                                          kernel_size=KSIZE, stride_list=STRIDES)
    jax.block_until_ready((mu, log_var))

    # downsampled by prod(STRIDES) = 2 along time
    assert mu.shape == (B, C_OUT, T // 2), mu.shape
    assert log_var.shape == (B, C_OUT, T // 2), log_var.shape
    assert bool(jnp.all(jnp.isfinite(mu))) and bool(jnp.all(jnp.isfinite(log_var)))

    print("KERNEL_OK")
</pallas_src>

<mosaic_0001>
module attributes {stable_mosaic.version = 11 : i64} {
  func.func @_encoder_kernel(%arg0: i32, %arg1: memref<1x16x4xf32, #tpu.memory_space<vmem>>, %arg2: memref<1x4x8xf32, #tpu.memory_space<vmem>>, %arg3: memref<1x8xf32, #tpu.memory_space<vmem>>, %arg4: memref<3x8x16xf32, #tpu.memory_space<vmem>>, %arg5: memref<1x16xf32, #tpu.memory_space<vmem>>, %arg6: memref<3x16x16xf32, #tpu.memory_space<vmem>>, %arg7: memref<1x16xf32, #tpu.memory_space<vmem>>, %arg8: memref<1x8x16xf32, #tpu.memory_space<vmem>>, %arg9: memref<1x16xf32, #tpu.memory_space<vmem>>, %arg10: memref<3x16x16xf32, #tpu.memory_space<vmem>>, %arg11: memref<1x16xf32, #tpu.memory_space<vmem>>, %arg12: memref<3x16x16xf32, #tpu.memory_space<vmem>>, %arg13: memref<1x16xf32, #tpu.memory_space<vmem>>, %arg14: memref<1x16x16xf32, #tpu.memory_space<vmem>>, %arg15: memref<1x16xf32, #tpu.memory_space<vmem>>, %arg16: memref<1x16x8xf32, #tpu.memory_space<vmem>>, %arg17: memref<1x8xf32, #tpu.memory_space<vmem>>, %arg18: memref<1x8x8xf32, #tpu.memory_space<vmem>>, %arg19: memref<32x16xf32, #tpu.memory_space<vmem>>) attributes {dimension_semantics = [#tpu.dimension_semantics<parallel>], iteration_bounds = array<i64: 2>, scalar_prefetch = 0 : i64, scratch_operands = 1 : i64, tpu.core_type = #tpu.core_type<tc>, window_params = [{transform_indices = @transform_0, window_bounds = array<i64: 1, 16, 4>}, {pipeline_mode = #tpu.pipeline_mode<synchronous>, transform_indices = @transform_1, window_bounds = array<i64: 1, 4, 8>}, {pipeline_mode = #tpu.pipeline_mode<synchronous>, transform_indices = @transform_2, window_bounds = array<i64: 1, 8>}, {pipeline_mode = #tpu.pipeline_mode<synchronous>, transform_indices = @transform_3, window_bounds = array<i64: 3, 8, 16>}, {pipeline_mode = #tpu.pipeline_mode<synchronous>, transform_indices = @transform_4, window_bounds = array<i64: 1, 16>}, {pipeline_mode = #tpu.pipeline_mode<synchronous>, transform_indices = @transform_5, window_bounds = array<i64: 3, 16, 16>}, {pipeline_mode = #tpu.pipeline_mode<synchronous>, transform_indices = @transform_6, window_bounds = array<i64: 1, 16>}, {pipeline_mode = #tpu.pipeline_mode<synchronous>, transform_indices = @transform_7, window_bounds = array<i64: 1, 8, 16>}, {pipeline_mode = #tpu.pipeline_mode<synchronous>, transform_indices = @transform_8, window_bounds = array<i64: 1, 16>}, {pipeline_mode = #tpu.pipeline_mode<synchronous>, transform_indices = @transform_9, window_bounds = array<i64: 3, 16, 16>}, {pipeline_mode = #tpu.pipeline_mode<synchronous>, transform_indices = @transform_10, window_bounds = array<i64: 1, 16>}, {pipeline_mode = #tpu.pipeline_mode<synchronous>, transform_indices = @transform_11, window_bounds = array<i64: 3, 16, 16>}, {pipeline_mode = #tpu.pipeline_mode<synchronous>, transform_indices = @transform_12, window_bounds = array<i64: 1, 16>}, {pipeline_mode = #tpu.pipeline_mode<synchronous>, transform_indices = @transform_13, window_bounds = array<i64: 1, 16, 16>}, {pipeline_mode = #tpu.pipeline_mode<synchronous>, transform_indices = @transform_14, window_bounds = array<i64: 1, 16>}, {pipeline_mode = #tpu.pipeline_mode<synchronous>, transform_indices = @transform_15, window_bounds = array<i64: 1, 16, 8>}, {pipeline_mode = #tpu.pipeline_mode<synchronous>, transform_indices = @transform_16, window_bounds = array<i64: 1, 8>}, {transform_indices = @transform_17, window_bounds = array<i64: 1, 8, 8>}]} {
    %c0 = arith.constant 0 : index
    %c0_0 = arith.constant 0 : index
    %c0_1 = arith.constant 0 : index
    %0 = vector.load %arg1[%c0, %c0_0, %c0_1] : memref<1x16x4xf32, #tpu.memory_space<vmem>>, vector<1x16x4xf32>
    %cst = arith.constant 9.99999971E-10 : f32
    %1 = vector.broadcast %cst : f32 to vector<1x16x4xf32>
    %2 = arith.addf %0, %1 : vector<1x16x4xf32>
    %3 = math.log %2 : vector<1x16x4xf32>
    %4 = vector.shape_cast %3 : vector<1x16x4xf32> to vector<16x4xf32>
    %c0_2 = arith.constant 0 : index
    %c0_3 = arith.constant 0 : index
    %c0_4 = arith.constant 0 : index
    %5 = vector.load %arg2[%c0_2, %c0_3, %c0_4] : memref<1x4x8xf32, #tpu.memory_space<vmem>>, vector<1x4x8xf32>
    %6 = vector.shape_cast %5 : vector<1x4x8xf32> to vector<4x8xf32>
    %cst_5 = arith.constant dense<0.000000e+00> : vector<16x8xf32>
    %7 = tpu.matmul %4, %6, %cst_5 {dimension_numbers = #tpu.dot_dimension_numbers<[1], [0], [0], [1], [0, 0, 1, 1], [], []>} : vector<16x4xf32>, vector<4x8xf32>, vector<16x8xf32> -> vector<16x8xf32>
    %c0_6 = arith.constant 0 : index
    %c0_7 = arith.constant 0 : index
    %8 = vector.load %arg3[%c0_6, %c0_7] : memref<1x8xf32, #tpu.memory_space<vmem>>, vector<1x8xf32>
    %9 = vector.broadcast %8 : vector<1x8xf32> to vector<16x8xf32>
    %10 = arith.addf %7, %9 : vector<16x8xf32>
    %11 = vector.shape_cast %10 : vector<16x8xf32> to vector<1x16x8xf32>
    %cst_8 = arith.constant dense<0.000000e+00> : vector<1x8xf32>
    %12 = vector.multi_reduction <add>, %11, %cst_8 [1] : vector<1x16x8xf32> to vector<1x8xf32>
    %13 = vector.shape_cast %12 : vector<1x8xf32> to vector<1x1x8xf32>
    %cst_9 = arith.constant 1.600000e+01 : f32
    %14 = vector.broadcast %cst_9 : f32 to vector<1x1x8xf32>
    %15 = arith.divf %13, %14 : vector<1x1x8xf32>
    %16 = vector.broadcast %15 : vector<1x1x8xf32> to vector<1x16x8xf32>
    %17 = arith.subf %11, %16 : vector<1x16x8xf32>
    %18 = arith.mulf %17, %17 : vector<1x16x8xf32>
    %cst_10 = arith.constant dense<0.000000e+00> : vector<1x8xf32>
    %19 = vector.multi_reduction <add>, %18, %cst_10 [1] : vector<1x16x8xf32> to vector<1x8xf32>
    %20 = vector.shape_cast %19 : vector<1x8xf32> to vector<1x1x8xf32>
    %cst_11 = arith.constant 1.600000e+01 : f32
    %21 = vector.broadcast %cst_11 : f32 to vector<1x1x8xf32>
    %22 = arith.divf %20, %21 : vector<1x1x8xf32>
    %23 = vector.broadcast %15 : vector<1x1x8xf32> to vector<1x16x8xf32>
    %24 = arith.subf %11, %23 : vector<1x16x8xf32>
    %cst_12 = arith.constant 9.99999974E-6 : f32
    %25 = vector.broadcast %cst_12 : f32 to vector<1x1x8xf32>
    %26 = arith.addf %22, %25 : vector<1x1x8xf32>
    %27 = math.rsqrt %26 : vector<1x1x8xf32>
    %28 = vector.broadcast %27 : vector<1x1x8xf32> to vector<1x16x8xf32>
    %29 = arith.mulf %24, %28 : vector<1x16x8xf32>
    %cst_13 = arith.constant 0.000000e+00 : f32
    %30 = vector.broadcast %cst_13 : f32 to vector<1x16x8xf32>
    %31 = arith.maximumf %29, %30 : vector<1x16x8xf32>
    %32 = vector.extract_strided_slice %31 {offsets = [0, 1, 0], sizes = [1, 1, 8], strides = [1, 1, 1]} : vector<1x16x8xf32> to vector<1x1x8xf32>
    %33 = vector.extract_strided_slice %31 {offsets = [0, 14, 0], sizes = [1, 1, 8], strides = [1, 1, 1]} : vector<1x16x8xf32> to vector<1x1x8xf32>
    %34 = tpu.concatenate %32, %31, %33 in 1 : vector<1x1x8xf32>, vector<1x16x8xf32>, vector<1x1x8xf32> -> vector<1x18x8xf32>
    %35 = vector.extract_strided_slice %34 {offsets = [0, 0, 0], sizes = [1, 16, 8], strides = [1, 1, 1]} : vector<1x18x8xf32> to vector<1x16x8xf32>
    %36 = vector.shape_cast %35 : vector<1x16x8xf32> to vector<16x8xf32>
    %c0_14 = arith.constant 0 : index
    %c0_15 = arith.constant 0 : index
    %c0_16 = arith.constant 0 : index
    %37 = vector.load %arg4[%c0_14, %c0_15, %c0_16] : memref<3x8x16xf32, #tpu.memory_space<vmem>>, vector<1x8x16xf32>
    %38 = vector.shape_cast %37 : vector<1x8x16xf32> to vector<8x16xf32>
    %cst_17 = arith.constant dense<0.000000e+00> : vector<16x16xf32>
    %39 = tpu.matmul %36, %38, %cst_17 {dimension_numbers = #tpu.dot_dimension_numbers<[1], [0], [0], [1], [0, 0, 1, 1], [], []>} : vector<16x8xf32>, vector<8x16xf32>, vector<16x16xf32> -> vector<16x16xf32>
    %40 = vector.extract_strided_slice %34 {offsets = [0, 1, 0], sizes = [1, 16, 8], strides = [1, 1, 1]} : vector<1x18x8xf32> to vector<1x16x8xf32>
    %41 = vector.shape_cast %40 : vector<1x16x8xf32> to vector<16x8xf32>
    %c1 = arith.constant 1 : index
    %c0_18 = arith.constant 0 : index
    %c0_19 = arith.constant 0 : index
    %42 = vector.load %arg4[%c1, %c0_18, %c0_19] : memref<3x8x16xf32, #tpu.memory_space<vmem>>, vector<1x8x16xf32>
    %43 = vector.shape_cast %42 : vector<1x8x16xf32> to vector<8x16xf32>
    %cst_20 = arith.constant dense<0.000000e+00> : vector<16x16xf32>
    %44 = tpu.matmul %41, %43, %cst_20 {dimension_numbers = #tpu.dot_dimension_numbers<[1], [0], [0], [1], [0, 0, 1, 1], [], []>} : vector<16x8xf32>, vector<8x16xf32>, vector<16x16xf32> -> vector<16x16xf32>
    %45 = arith.addf %39, %44 : vector<16x16xf32>
    %46 = vector.extract_strided_slice %34 {offsets = [0, 2, 0], sizes = [1, 16, 8], strides = [1, 1, 1]} : vector<1x18x8xf32> to vector<1x16x8xf32>
    %47 = vector.shape_cast %46 : vector<1x16x8xf32> to vector<16x8xf32>
    %c2 = arith.constant 2 : index
    %c0_21 = arith.constant 0 : index
    %c0_22 = arith.constant 0 : index
    %48 = vector.load %arg4[%c2, %c0_21, %c0_22] : memref<3x8x16xf32, #tpu.memory_space<vmem>>, vector<1x8x16xf32>
    %49 = vector.shape_cast %48 : vector<1x8x16xf32> to vector<8x16xf32>
    %cst_23 = arith.constant dense<0.000000e+00> : vector<16x16xf32>
    %50 = tpu.matmul %47, %49, %cst_23 {dimension_numbers = #tpu.dot_dimension_numbers<[1], [0], [0], [1], [0, 0, 1, 1], [], []>} : vector<16x8xf32>, vector<8x16xf32>, vector<16x16xf32> -> vector<16x16xf32>
    %51 = arith.addf %45, %50 : vector<16x16xf32>
    %c0_24 = arith.constant 0 : index
    %c0_25 = arith.constant 0 : index
    %52 = vector.load %arg5[%c0_24, %c0_25] : memref<1x16xf32, #tpu.memory_space<vmem>>, vector<1x16xf32>
    %53 = vector.broadcast %52 : vector<1x16xf32> to vector<16x16xf32>
    %54 = arith.addf %51, %53 : vector<16x16xf32>
    %55 = vector.shape_cast %54 : vector<16x16xf32> to vector<1x16x16xf32>
    %cst_26 = arith.constant dense<0.000000e+00> : vector<1x16xf32>
    %56 = vector.multi_reduction <add>, %55, %cst_26 [1] : vector<1x16x16xf32> to vector<1x16xf32>
    %57 = vector.shape_cast %56 : vector<1x16xf32> to vector<1x1x16xf32>
    %cst_27 = arith.constant 1.600000e+01 : f32
    %58 = vector.broadcast %cst_27 : f32 to vector<1x1x16xf32>
    %59 = arith.divf %57, %58 : vector<1x1x16xf32>
    %60 = vector.broadcast %59 : vector<1x1x16xf32> to vector<1x16x16xf32>
    %61 = arith.subf %55, %60 : vector<1x16x16xf32>
    %62 = arith.mulf %61, %61 : vector<1x16x16xf32>
    %cst_28 = arith.constant dense<0.000000e+00> : vector<1x16xf32>
    %63 = vector.multi_reduction <add>, %62, %cst_28 [1] : vector<1x16x16xf32> to vector<1x16xf32>
    %64 = vector.shape_cast %63 : vector<1x16xf32> to vector<1x1x16xf32>
    %cst_29 = arith.constant 1.600000e+01 : f32
    %65 = vector.broadcast %cst_29 : f32 to vector<1x1x16xf32>
    %66 = arith.divf %64, %65 : vector<1x1x16xf32>
    %67 = vector.broadcast %59 : vector<1x1x16xf32> to vector<1x16x16xf32>
    %68 = arith.subf %55, %67 : vector<1x16x16xf32>
    %cst_30 = arith.constant 9.99999974E-6 : f32
    %69 = vector.broadcast %cst_30 : f32 to vector<1x1x16xf32>
    %70 = arith.addf %66, %69 : vector<1x1x16xf32>
    %71 = math.rsqrt %70 : vector<1x1x16xf32>
    %72 = vector.broadcast %71 : vector<1x1x16xf32> to vector<1x16x16xf32>
    %73 = arith.mulf %68, %72 : vector<1x16x16xf32>
    %cst_31 = arith.constant 0.000000e+00 : f32
    %74 = vector.broadcast %cst_31 : f32 to vector<1x16x16xf32>
    %75 = arith.maximumf %73, %74 : vector<1x16x16xf32>
    %76 = vector.extract_strided_slice %75 {offsets = [0, 1, 0], sizes = [1, 1, 16], strides = [1, 1, 1]} : vector<1x16x16xf32> to vector<1x1x16xf32>
    %77 = vector.extract_strided_slice %75 {offsets = [0, 14, 0], sizes = [1, 1, 16], strides = [1, 1, 1]} : vector<1x16x16xf32> to vector<1x1x16xf32>
    %78 = tpu.concatenate %76, %75, %77 in 1 : vector<1x1x16xf32>, vector<1x16x16xf32>, vector<1x1x16xf32> -> vector<1x18x16xf32>
    %79 = vector.extract_strided_slice %78 {offsets = [0, 0, 0], sizes = [1, 16, 16], strides = [1, 1, 1]} : vector<1x18x16xf32> to vector<1x16x16xf32>
    %80 = vector.shape_cast %79 : vector<1x16x16xf32> to vector<16x16xf32>
    %c0_32 = arith.constant 0 : index
    %c0_33 = arith.constant 0 : index
    %c0_34 = arith.constant 0 : index
    %81 = vector.load %arg6[%c0_32, %c0_33, %c0_34] : memref<3x16x16xf32, #tpu.memory_space<vmem>>, vector<1x16x16xf32>
    %82 = vector.shape_cast %81 : vector<1x16x16xf32> to vector<16x16xf32>
    %cst_35 = arith.constant dense<0.000000e+00> : vector<16x16xf32>
    %83 = tpu.matmul %80, %82, %cst_35 {dimension_numbers = #tpu.dot_dimension_numbers<[1], [0], [0], [1], [0, 0, 1, 1], [], []>} : vector<16x16xf32>, vector<16x16xf32>, vector<16x16xf32> -> vector<16x16xf32>
    %84 = vector.extract_strided_slice %78 {offsets = [0, 1, 0], sizes = [1, 16, 16], strides = [1, 1, 1]} : vector<1x18x16xf32> to vector<1x16x16xf32>
    %85 = vector.shape_cast %84 : vector<1x16x16xf32> to vector<16x16xf32>
    %c1_36 = arith.constant 1 : index
    %c0_37 = arith.constant 0 : index
    %c0_38 = arith.constant 0 : index
    %86 = vector.load %arg6[%c1_36, %c0_37, %c0_38] : memref<3x16x16xf32, #tpu.memory_space<vmem>>, vector<1x16x16xf32>
    %87 = vector.shape_cast %86 : vector<1x16x16xf32> to vector<16x16xf32>
    %cst_39 = arith.constant dense<0.000000e+00> : vector<16x16xf32>
    %88 = tpu.matmul %85, %87, %cst_39 {dimension_numbers = #tpu.dot_dimension_numbers<[1], [0], [0], [1], [0, 0, 1, 1], [], []>} : vector<16x16xf32>, vector<16x16xf32>, vector<16x16xf32> -> vector<16x16xf32>
    %89 = arith.addf %83, %88 : vector<16x16xf32>
    %90 = vector.extract_strided_slice %78 {offsets = [0, 2, 0], sizes = [1, 16, 16], strides = [1, 1, 1]} : vector<1x18x16xf32> to vector<1x16x16xf32>
    %91 = vector.shape_cast %90 : vector<1x16x16xf32> to vector<16x16xf32>
    %c2_40 = arith.constant 2 : index
    %c0_41 = arith.constant 0 : index
    %c0_42 = arith.constant 0 : index
    %92 = vector.load %arg6[%c2_40, %c0_41, %c0_42] : memref<3x16x16xf32, #tpu.memory_space<vmem>>, vector<1x16x16xf32>
    %93 = vector.shape_cast %92 : vector<1x16x16xf32> to vector<16x16xf32>
    %cst_43 = arith.constant dense<0.000000e+00> : vector<16x16xf32>
    %94 = tpu.matmul %91, %93, %cst_43 {dimension_numbers = #tpu.dot_dimension_numbers<[1], [0], [0], [1], [0, 0, 1, 1], [], []>} : vector<16x16xf32>, vector<16x16xf32>, vector<16x16xf32> -> vector<16x16xf32>
    %95 = arith.addf %89, %94 : vector<16x16xf32>
    %c0_44 = arith.constant 0 : index
    %c0_45 = arith.constant 0 : index
    %96 = vector.load %arg7[%c0_44, %c0_45] : memref<1x16xf32, #tpu.memory_space<vmem>>, vector<1x16xf32>
    %97 = vector.broadcast %96 : vector<1x16xf32> to vector<16x16xf32>
    %98 = arith.addf %95, %97 : vector<16x16xf32>
    %99 = vector.shape_cast %98 : vector<16x16xf32> to vector<1x16x16xf32>
    %cst_46 = arith.constant dense<0.000000e+00> : vector<1x16xf32>
    %100 = vector.multi_reduction <add>, %99, %cst_46 [1] : vector<1x16x16xf32> to vector<1x16xf32>
    %101 = vector.shape_cast %100 : vector<1x16xf32> to vector<1x1x16xf32>
    %cst_47 = arith.constant 1.600000e+01 : f32
    %102 = vector.broadcast %cst_47 : f32 to vector<1x1x16xf32>
    %103 = arith.divf %101, %102 : vector<1x1x16xf32>
    %104 = vector.broadcast %103 : vector<1x1x16xf32> to vector<1x16x16xf32>
    %105 = arith.subf %99, %104 : vector<1x16x16xf32>
    %106 = arith.mulf %105, %105 : vector<1x16x16xf32>
    %cst_48 = arith.constant dense<0.000000e+00> : vector<1x16xf32>
    %107 = vector.multi_reduction <add>, %106, %cst_48 [1] : vector<1x16x16xf32> to vector<1x16xf32>
    %108 = vector.shape_cast %107 : vector<1x16xf32> to vector<1x1x16xf32>
    %cst_49 = arith.constant 1.600000e+01 : f32
    %109 = vector.broadcast %cst_49 : f32 to vector<1x1x16xf32>
    %110 = arith.divf %108, %109 : vector<1x1x16xf32>
    %111 = vector.broadcast %103 : vector<1x1x16xf32> to vector<1x16x16xf32>
    %112 = arith.subf %99, %111 : vector<1x16x16xf32>
    %cst_50 = arith.constant 9.99999974E-6 : f32
    %113 = vector.broadcast %cst_50 : f32 to vector<1x1x16xf32>
    %114 = arith.addf %110, %113 : vector<1x1x16xf32>
    %115 = math.rsqrt %114 : vector<1x1x16xf32>
    %116 = vector.broadcast %115 : vector<1x1x16xf32> to vector<1x16x16xf32>
    %117 = arith.mulf %112, %116 : vector<1x16x16xf32>
    %cst_51 = arith.constant 0.000000e+00 : f32
    %118 = vector.broadcast %cst_51 : f32 to vector<1x16x16xf32>
    %119 = arith.maximumf %117, %118 : vector<1x16x16xf32>
    %120 = vector.shape_cast %31 : vector<1x16x8xf32> to vector<16x8xf32>
    %c0_52 = arith.constant 0 : index
    %c0_53 = arith.constant 0 : index
    %c0_54 = arith.constant 0 : index
    %121 = vector.load %arg8[%c0_52, %c0_53, %c0_54] : memref<1x8x16xf32, #tpu.memory_space<vmem>>, vector<1x8x16xf32>
    %122 = vector.shape_cast %121 : vector<1x8x16xf32> to vector<8x16xf32>
    %cst_55 = arith.constant dense<0.000000e+00> : vector<16x16xf32>
    %123 = tpu.matmul %120, %122, %cst_55 {dimension_numbers = #tpu.dot_dimension_numbers<[1], [0], [0], [1], [0, 0, 1, 1], [], []>} : vector<16x8xf32>, vector<8x16xf32>, vector<16x16xf32> -> vector<16x16xf32>
    %c0_56 = arith.constant 0 : index
    %c0_57 = arith.constant 0 : index
    %124 = vector.load %arg9[%c0_56, %c0_57] : memref<1x16xf32, #tpu.memory_space<vmem>>, vector<1x16xf32>
    %125 = vector.broadcast %124 : vector<1x16xf32> to vector<16x16xf32>
    %126 = arith.addf %123, %125 : vector<16x16xf32>
    %127 = vector.shape_cast %126 : vector<16x16xf32> to vector<1x16x16xf32>
    %128 = arith.addf %127, %119 : vector<1x16x16xf32>
    %129 = vector.extract_strided_slice %128 {offsets = [0, 1, 0], sizes = [1, 1, 16], strides = [1, 1, 1]} : vector<1x16x16xf32> to vector<1x1x16xf32>
    %130 = vector.extract_strided_slice %128 {offsets = [0, 14, 0], sizes = [1, 1, 16], strides = [1, 1, 1]} : vector<1x16x16xf32> to vector<1x1x16xf32>
    %131 = tpu.concatenate %129, %128, %130 in 1 : vector<1x1x16xf32>, vector<1x16x16xf32>, vector<1x1x16xf32> -> vector<1x18x16xf32>
    %132 = vector.extract_strided_slice %131 {offsets = [0, 0, 0], sizes = [1, 16, 16], strides = [1, 1, 1]} : vector<1x18x16xf32> to vector<1x16x16xf32>
    %133 = vector.shape_cast %132 : vector<1x16x16xf32> to vector<16x16xf32>
    %c0_58 = arith.constant 0 : index
    %c0_59 = arith.constant 0 : index
    %c0_60 = arith.constant 0 : index
    %134 = vector.load %arg10[%c0_58, %c0_59, %c0_60] : memref<3x16x16xf32, #tpu.memory_space<vmem>>, vector<1x16x16xf32>
    %135 = vector.shape_cast %134 : vector<1x16x16xf32> to vector<16x16xf32>
    %cst_61 = arith.constant dense<0.000000e+00> : vector<16x16xf32>
    %136 = tpu.matmul %133, %135, %cst_61 {dimension_numbers = #tpu.dot_dimension_numbers<[1], [0], [0], [1], [0, 0, 1, 1], [], []>} : vector<16x16xf32>, vector<16x16xf32>, vector<16x16xf32> -> vector<16x16xf32>
    %137 = vector.extract_strided_slice %131 {offsets = [0, 1, 0], sizes = [1, 16, 16], strides = [1, 1, 1]} : vector<1x18x16xf32> to vector<1x16x16xf32>
    %138 = vector.shape_cast %137 : vector<1x16x16xf32> to vector<16x16xf32>
    %c1_62 = arith.constant 1 : index
    %c0_63 = arith.constant 0 : index
    %c0_64 = arith.constant 0 : index
    %139 = vector.load %arg10[%c1_62, %c0_63, %c0_64] : memref<3x16x16xf32, #tpu.memory_space<vmem>>, vector<1x16x16xf32>
    %140 = vector.shape_cast %139 : vector<1x16x16xf32> to vector<16x16xf32>
    %cst_65 = arith.constant dense<0.000000e+00> : vector<16x16xf32>
    %141 = tpu.matmul %138, %140, %cst_65 {dimension_numbers = #tpu.dot_dimension_numbers<[1], [0], [0], [1], [0, 0, 1, 1], [], []>} : vector<16x16xf32>, vector<16x16xf32>, vector<16x16xf32> -> vector<16x16xf32>
    %142 = arith.addf %136, %141 : vector<16x16xf32>
    %143 = vector.extract_strided_slice %131 {offsets = [0, 2, 0], sizes = [1, 16, 16], strides = [1, 1, 1]} : vector<1x18x16xf32> to vector<1x16x16xf32>
    %144 = vector.shape_cast %143 : vector<1x16x16xf32> to vector<16x16xf32>
    %c2_66 = arith.constant 2 : index
    %c0_67 = arith.constant 0 : index
    %c0_68 = arith.constant 0 : index
    %145 = vector.load %arg10[%c2_66, %c0_67, %c0_68] : memref<3x16x16xf32, #tpu.memory_space<vmem>>, vector<1x16x16xf32>
    %146 = vector.shape_cast %145 : vector<1x16x16xf32> to vector<16x16xf32>
    %cst_69 = arith.constant dense<0.000000e+00> : vector<16x16xf32>
    %147 = tpu.matmul %144, %146, %cst_69 {dimension_numbers = #tpu.dot_dimension_numbers<[1], [0], [0], [1], [0, 0, 1, 1], [], []>} : vector<16x16xf32>, vector<16x16xf32>, vector<16x16xf32> -> vector<16x16xf32>
    %148 = arith.addf %142, %147 : vector<16x16xf32>
    %c0_70 = arith.constant 0 : index
    %c0_71 = arith.constant 0 : index
    %149 = vector.load %arg11[%c0_70, %c0_71] : memref<1x16xf32, #tpu.memory_space<vmem>>, vector<1x16xf32>
    %150 = vector.broadcast %149 : vector<1x16xf32> to vector<16x16xf32>
    %151 = arith.addf %148, %150 : vector<16x16xf32>
    %152 = vector.shape_cast %151 : vector<16x16xf32> to vector<1x16x16xf32>
    %cst_72 = arith.constant dense<0.000000e+00> : vector<1x16xf32>
    %153 = vector.multi_reduction <add>, %152, %cst_72 [1] : vector<1x16x16xf32> to vector<1x16xf32>
    %154 = vector.shape_cast %153 : vector<1x16xf32> to vector<1x1x16xf32>
    %cst_73 = arith.constant 1.600000e+01 : f32
    %155 = vector.broadcast %cst_73 : f32 to vector<1x1x16xf32>
    %156 = arith.divf %154, %155 : vector<1x1x16xf32>
    %157 = vector.broadcast %156 : vector<1x1x16xf32> to vector<1x16x16xf32>
    %158 = arith.subf %152, %157 : vector<1x16x16xf32>
    %159 = arith.mulf %158, %158 : vector<1x16x16xf32>
    %cst_74 = arith.constant dense<0.000000e+00> : vector<1x16xf32>
    %160 = vector.multi_reduction <add>, %159, %cst_74 [1] : vector<1x16x16xf32> to vector<1x16xf32>
    %161 = vector.shape_cast %160 : vector<1x16xf32> to vector<1x1x16xf32>
    %cst_75 = arith.constant 1.600000e+01 : f32
    %162 = vector.broadcast %cst_75 : f32 to vector<1x1x16xf32>
    %163 = arith.divf %161, %162 : vector<1x1x16xf32>
    %164 = vector.broadcast %156 : vector<1x1x16xf32> to vector<1x16x16xf32>
    %165 = arith.subf %152, %164 : vector<1x16x16xf32>
    %cst_76 = arith.constant 9.99999974E-6 : f32
    %166 = vector.broadcast %cst_76 : f32 to vector<1x1x16xf32>
    %167 = arith.addf %163, %166 : vector<1x1x16xf32>
    %168 = math.rsqrt %167 : vector<1x1x16xf32>
    %169 = vector.broadcast %168 : vector<1x1x16xf32> to vector<1x16x16xf32>
    %170 = arith.mulf %165, %169 : vector<1x16x16xf32>
    %cst_77 = arith.constant 0.000000e+00 : f32
    %171 = vector.broadcast %cst_77 : f32 to vector<1x16x16xf32>
    %172 = arith.maximumf %170, %171 : vector<1x16x16xf32>
    %173 = vector.extract_strided_slice %172 {offsets = [0, 1, 0], sizes = [1, 1, 16], strides = [1, 1, 1]} : vector<1x16x16xf32> to vector<1x1x16xf32>
    %174 = vector.extract_strided_slice %172 {offsets = [0, 14, 0], sizes = [1, 1, 16], strides = [1, 1, 1]} : vector<1x16x16xf32> to vector<1x1x16xf32>
    %175 = tpu.concatenate %173, %172, %174 in 1 : vector<1x1x16xf32>, vector<1x16x16xf32>, vector<1x1x16xf32> -> vector<1x18x16xf32>
    %176 = vector.extract_strided_slice %175 {offsets = [0, 0, 0], sizes = [1, 16, 16], strides = [1, 1, 1]} : vector<1x18x16xf32> to vector<1x16x16xf32>
    %177 = vector.shape_cast %176 : vector<1x16x16xf32> to vector<16x16xf32>
    %c0_78 = arith.constant 0 : index
    %c0_79 = arith.constant 0 : index
    %c0_80 = arith.constant 0 : index
    %178 = vector.load %arg12[%c0_78, %c0_79, %c0_80] : memref<3x16x16xf32, #tpu.memory_space<vmem>>, vector<1x16x16xf32>
    %179 = vector.shape_cast %178 : vector<1x16x16xf32> to vector<16x16xf32>
    %cst_81 = arith.constant dense<0.000000e+00> : vector<16x16xf32>
    %180 = tpu.matmul %177, %179, %cst_81 {dimension_numbers = #tpu.dot_dimension_numbers<[1], [0], [0], [1], [0, 0, 1, 1], [], []>} : vector<16x16xf32>, vector<16x16xf32>, vector<16x16xf32> -> vector<16x16xf32>
    %181 = vector.extract_strided_slice %175 {offsets = [0, 1, 0], sizes = [1, 16, 16], strides = [1, 1, 1]} : vector<1x18x16xf32> to vector<1x16x16xf32>
    %182 = vector.shape_cast %181 : vector<1x16x16xf32> to vector<16x16xf32>
    %c1_82 = arith.constant 1 : index
    %c0_83 = arith.constant 0 : index
    %c0_84 = arith.constant 0 : index
    %183 = vector.load %arg12[%c1_82, %c0_83, %c0_84] : memref<3x16x16xf32, #tpu.memory_space<vmem>>, vector<1x16x16xf32>
    %184 = vector.shape_cast %183 : vector<1x16x16xf32> to vector<16x16xf32>
    %cst_85 = arith.constant dense<0.000000e+00> : vector<16x16xf32>
    %185 = tpu.matmul %182, %184, %cst_85 {dimension_numbers = #tpu.dot_dimension_numbers<[1], [0], [0], [1], [0, 0, 1, 1], [], []>} : vector<16x16xf32>, vector<16x16xf32>, vector<16x16xf32> -> vector<16x16xf32>
    %186 = arith.addf %180, %185 : vector<16x16xf32>
    %187 = vector.extract_strided_slice %175 {offsets = [0, 2, 0], sizes = [1, 16, 16], strides = [1, 1, 1]} : vector<1x18x16xf32> to vector<1x16x16xf32>
    %188 = vector.shape_cast %187 : vector<1x16x16xf32> to vector<16x16xf32>
    %c2_86 = arith.constant 2 : index
    %c0_87 = arith.constant 0 : index
    %c0_88 = arith.constant 0 : index
    %189 = vector.load %arg12[%c2_86, %c0_87, %c0_88] : memref<3x16x16xf32, #tpu.memory_space<vmem>>, vector<1x16x16xf32>
    %190 = vector.shape_cast %189 : vector<1x16x16xf32> to vector<16x16xf32>
    %cst_89 = arith.constant dense<0.000000e+00> : vector<16x16xf32>
    %191 = tpu.matmul %188, %190, %cst_89 {dimension_numbers = #tpu.dot_dimension_numbers<[1], [0], [0], [1], [0, 0, 1, 1], [], []>} : vector<16x16xf32>, vector<16x16xf32>, vector<16x16xf32> -> vector<16x16xf32>
    %192 = arith.addf %186, %191 : vector<16x16xf32>
    %c0_90 = arith.constant 0 : index
    %c0_91 = arith.constant 0 : index
    %193 = vector.load %arg13[%c0_90, %c0_91] : memref<1x16xf32, #tpu.memory_space<vmem>>, vector<1x16xf32>
    %194 = vector.broadcast %193 : vector<1x16xf32> to vector<16x16xf32>
    %195 = arith.addf %192, %194 : vector<16x16xf32>
    %196 = vector.shape_cast %195 : vector<16x16xf32> to vector<1x16x16xf32>
    %197 = vector.shape_cast %196 : vector<1x16x16xf32> to vector<16x16xf32>
    %c0_92 = arith.constant 0 : index
    %c0_93 = arith.constant 0 : index
    %198 = vector.load %arg19[%c0_92, %c0_93] : memref<32x16xf32, #tpu.memory_space<vmem>>, vector<16x16xf32>
    tpu.vector_store %arg19[%c0_92, %c0_93], %197 {strides = array<i32>} : memref<32x16xf32, #tpu.memory_space<vmem>>, vector<16x16xf32>,
    %c0_94 = arith.constant 0 : index
    %c0_95 = arith.constant 0 : index
    %199 = tpu.strided_load %arg19[%c0_94, %c0_95] {strides = array<i32: 2, 1>} : memref<32x16xf32, #tpu.memory_space<vmem>>, vector<8x16xf32>
    %200 = vector.shape_cast %199 : vector<8x16xf32> to vector<1x8x16xf32>
    %cst_96 = arith.constant dense<0.000000e+00> : vector<1x16xf32>
    %201 = vector.multi_reduction <add>, %200, %cst_96 [1] : vector<1x8x16xf32> to vector<1x16xf32>
    %202 = vector.shape_cast %201 : vector<1x16xf32> to vector<1x1x16xf32>
    %cst_97 = arith.constant 8.000000e+00 : f32
    %203 = vector.broadcast %cst_97 : f32 to vector<1x1x16xf32>
    %204 = arith.divf %202, %203 : vector<1x1x16xf32>
    %205 = vector.broadcast %204 : vector<1x1x16xf32> to vector<1x8x16xf32>
    %206 = arith.subf %200, %205 : vector<1x8x16xf32>
    %207 = arith.mulf %206, %206 : vector<1x8x16xf32>
    %cst_98 = arith.constant dense<0.000000e+00> : vector<1x16xf32>
    %208 = vector.multi_reduction <add>, %207, %cst_98 [1] : vector<1x8x16xf32> to vector<1x16xf32>
    %209 = vector.shape_cast %208 : vector<1x16xf32> to vector<1x1x16xf32>
    %cst_99 = arith.constant 8.000000e+00 : f32
    %210 = vector.broadcast %cst_99 : f32 to vector<1x1x16xf32>
    %211 = arith.divf %209, %210 : vector<1x1x16xf32>
    %212 = vector.broadcast %204 : vector<1x1x16xf32> to vector<1x8x16xf32>
    %213 = arith.subf %200, %212 : vector<1x8x16xf32>
    %cst_100 = arith.constant 9.99999974E-6 : f32
    %214 = vector.broadcast %cst_100 : f32 to vector<1x1x16xf32>
    %215 = arith.addf %211, %214 : vector<1x1x16xf32>
    %216 = math.rsqrt %215 : vector<1x1x16xf32>
    %217 = vector.broadcast %216 : vector<1x1x16xf32> to vector<1x8x16xf32>
    %218 = arith.mulf %213, %217 : vector<1x8x16xf32>
    %cst_101 = arith.constant 0.000000e+00 : f32
    %219 = vector.broadcast %cst_101 : f32 to vector<1x8x16xf32>
    %220 = arith.maximumf %218, %219 : vector<1x8x16xf32>
    %221 = vector.shape_cast %128 : vector<1x16x16xf32> to vector<16x16xf32>
    %c0_102 = arith.constant 0 : index
    %c0_103 = arith.constant 0 : index
    %c0_104 = arith.constant 0 : index
    %222 = vector.load %arg14[%c0_102, %c0_103, %c0_104] : memref<1x16x16xf32, #tpu.memory_space<vmem>>, vector<1x16x16xf32>
    %223 = vector.shape_cast %222 : vector<1x16x16xf32> to vector<16x16xf32>
    %cst_105 = arith.constant dense<0.000000e+00> : vector<16x16xf32>
    %224 = tpu.matmul %221, %223, %cst_105 {dimension_numbers = #tpu.dot_dimension_numbers<[1], [0], [0], [1], [0, 0, 1, 1], [], []>} : vector<16x16xf32>, vector<16x16xf32>, vector<16x16xf32> -> vector<16x16xf32>
    %c0_106 = arith.constant 0 : index
    %c0_107 = arith.constant 0 : index
    %225 = vector.load %arg15[%c0_106, %c0_107] : memref<1x16xf32, #tpu.memory_space<vmem>>, vector<1x16xf32>
    %226 = vector.broadcast %225 : vector<1x16xf32> to vector<16x16xf32>
    %227 = arith.addf %224, %226 : vector<16x16xf32>
    %228 = vector.shape_cast %227 : vector<16x16xf32> to vector<1x16x16xf32>
    %229 = vector.shape_cast %228 : vector<1x16x16xf32> to vector<16x16xf32>
    %c0_108 = arith.constant 0 : index
    %c0_109 = arith.constant 0 : index
    %230 = vector.load %arg19[%c0_108, %c0_109] : memref<32x16xf32, #tpu.memory_space<vmem>>, vector<16x16xf32>
    tpu.vector_store %arg19[%c0_108, %c0_109], %229 {strides = array<i32>} : memref<32x16xf32, #tpu.memory_space<vmem>>, vector<16x16xf32>,
    %c0_110 = arith.constant 0 : index
    %c0_111 = arith.constant 0 : index
    %231 = tpu.strided_load %arg19[%c0_110, %c0_111] {strides = array<i32: 2, 1>} : memref<32x16xf32, #tpu.memory_space<vmem>>, vector<8x16xf32>
    %232 = vector.shape_cast %231 : vector<8x16xf32> to vector<1x8x16xf32>
    %c1_112 = arith.constant 1 : index
    %c0_113 = arith.constant 0 : index
    %233 = tpu.strided_load %arg19[%c1_112, %c0_113] {strides = array<i32: 2, 1>} : memref<32x16xf32, #tpu.memory_space<vmem>>, vector<8x16xf32>
    %234 = vector.shape_cast %233 : vector<8x16xf32> to vector<1x8x16xf32>
    %235 = arith.addf %232, %234 : vector<1x8x16xf32>
    %cst_114 = arith.constant 5.000000e-01 : f32
    %236 = vector.broadcast %cst_114 : f32 to vector<1x8x16xf32>
    %237 = arith.mulf %235, %236 : vector<1x8x16xf32>
    %238 = arith.addf %237, %220 : vector<1x8x16xf32>
    %239 = vector.shape_cast %238 : vector<1x8x16xf32> to vector<8x16xf32>
    %c0_115 = arith.constant 0 : index
    %c0_116 = arith.constant 0 : index
    %c0_117 = arith.constant 0 : index
    %240 = vector.load %arg16[%c0_115, %c0_116, %c0_117] : memref<1x16x8xf32, #tpu.memory_space<vmem>>, vector<1x16x8xf32>
    %241 = vector.shape_cast %240 : vector<1x16x8xf32> to vector<16x8xf32>
    %cst_118 = arith.constant dense<0.000000e+00> : vector<8x8xf32>
    %242 = tpu.matmul %239, %241, %cst_118 {dimension_numbers = #tpu.dot_dimension_numbers<[1], [0], [0], [1], [0, 0, 1, 1], [], []>} : vector<8x16xf32>, vector<16x8xf32>, vector<8x8xf32> -> vector<8x8xf32>
    %c0_119 = arith.constant 0 : index
    %c0_120 = arith.constant 0 : index
    %243 = vector.load %arg17[%c0_119, %c0_120] : memref<1x8xf32, #tpu.memory_space<vmem>>, vector<1x8xf32>
    %244 = vector.broadcast %243 : vector<1x8xf32> to vector<8x8xf32>
    %245 = arith.addf %242, %244 : vector<8x8xf32>
    %246 = vector.shape_cast %245 : vector<8x8xf32> to vector<1x8x8xf32>
    %c0_121 = arith.constant 0 : index
    %c0_122 = arith.constant 0 : index
    %c0_123 = arith.constant 0 : index
    %247 = vector.load %arg18[%c0_121, %c0_122, %c0_123] : memref<1x8x8xf32, #tpu.memory_space<vmem>>, vector<1x8x8xf32>
    tpu.vector_store %arg18[%c0_121, %c0_122, %c0_123], %246 {strides = array<i32>} : memref<1x8x8xf32, #tpu.memory_space<vmem>>, vector<1x8x8xf32>,
    return
  }
  func.func @transform_0(%arg0: i32) -> (i32, i32, i32) {
    %c0_i32 = arith.constant 0 : i32
    %c0_i32_0 = arith.constant 0 : i32
    %c0_i32_1 = arith.constant 0 : i32
    return %arg0, %c0_i32, %c0_i32_0 : i32, i32, i32
  }
  func.func @transform_1(%arg0: i32) -> (i32, i32, i32) {
    %c0_i32 = arith.constant 0 : i32
    %c0_i32_0 = arith.constant 0 : i32
    %c0_i32_1 = arith.constant 0 : i32
    %c0_i32_2 = arith.constant 0 : i32
    return %c0_i32, %c0_i32_0, %c0_i32_1 : i32, i32, i32
  }
  func.func @transform_2(%arg0: i32) -> (i32, i32) {
    %c0_i32 = arith.constant 0 : i32
    %c0_i32_0 = arith.constant 0 : i32
    %c0_i32_1 = arith.constant 0 : i32
    return %c0_i32, %c0_i32_0 : i32, i32
  }
  func.func @transform_3(%arg0: i32) -> (i32, i32, i32) {
    %c0_i32 = arith.constant 0 : i32
    %c0_i32_0 = arith.constant 0 : i32
    %c0_i32_1 = arith.constant 0 : i32
    %c0_i32_2 = arith.constant 0 : i32
    return %c0_i32, %c0_i32_0, %c0_i32_1 : i32, i32, i32
  }
  func.func @transform_4(%arg0: i32) -> (i32, i32) {
    %c0_i32 = arith.constant 0 : i32
    %c0_i32_0 = arith.constant 0 : i32
    %c0_i32_1 = arith.constant 0 : i32
    return %c0_i32, %c0_i32_0 : i32, i32
  }
  func.func @transform_5(%arg0: i32) -> (i32, i32, i32) {
    %c0_i32 = arith.constant 0 : i32
    %c0_i32_0 = arith.constant 0 : i32
    %c0_i32_1 = arith.constant 0 : i32
    %c0_i32_2 = arith.constant 0 : i32
    return %c0_i32, %c0_i32_0, %c0_i32_1 : i32, i32, i32
  }
  func.func @transform_6(%arg0: i32) -> (i32, i32) {
    %c0_i32 = arith.constant 0 : i32
    %c0_i32_0 = arith.constant 0 : i32
    %c0_i32_1 = arith.constant 0 : i32
    return %c0_i32, %c0_i32_0 : i32, i32
  }
  func.func @transform_7(%arg0: i32) -> (i32, i32, i32) {
    %c0_i32 = arith.constant 0 : i32
    %c0_i32_0 = arith.constant 0 : i32
    %c0_i32_1 = arith.constant 0 : i32
    %c0_i32_2 = arith.constant 0 : i32
    return %c0_i32, %c0_i32_0, %c0_i32_1 : i32, i32, i32
  }
  func.func @transform_8(%arg0: i32) -> (i32, i32) {
    %c0_i32 = arith.constant 0 : i32
    %c0_i32_0 = arith.constant 0 : i32
    %c0_i32_1 = arith.constant 0 : i32
    return %c0_i32, %c0_i32_0 : i32, i32
  }
  func.func @transform_9(%arg0: i32) -> (i32, i32, i32) {
    %c0_i32 = arith.constant 0 : i32
    %c0_i32_0 = arith.constant 0 : i32
    %c0_i32_1 = arith.constant 0 : i32
    %c0_i32_2 = arith.constant 0 : i32
    return %c0_i32, %c0_i32_0, %c0_i32_1 : i32, i32, i32
  }
  func.func @transform_10(%arg0: i32) -> (i32, i32) {
    %c0_i32 = arith.constant 0 : i32
    %c0_i32_0 = arith.constant 0 : i32
    %c0_i32_1 = arith.constant 0 : i32
    return %c0_i32, %c0_i32_0 : i32, i32
  }
  func.func @transform_11(%arg0: i32) -> (i32, i32, i32) {
    %c0_i32 = arith.constant 0 : i32
    %c0_i32_0 = arith.constant 0 : i32
    %c0_i32_1 = arith.constant 0 : i32
    %c0_i32_2 = arith.constant 0 : i32
    return %c0_i32, %c0_i32_0, %c0_i32_1 : i32, i32, i32
  }
  func.func @transform_12(%arg0: i32) -> (i32, i32) {
    %c0_i32 = arith.constant 0 : i32
    %c0_i32_0 = arith.constant 0 : i32
    %c0_i32_1 = arith.constant 0 : i32
    return %c0_i32, %c0_i32_0 : i32, i32
  }
  func.func @transform_13(%arg0: i32) -> (i32, i32, i32) {
    %c0_i32 = arith.constant 0 : i32
    %c0_i32_0 = arith.constant 0 : i32
    %c0_i32_1 = arith.constant 0 : i32
    %c0_i32_2 = arith.constant 0 : i32
    return %c0_i32, %c0_i32_0, %c0_i32_1 : i32, i32, i32
  }
  func.func @transform_14(%arg0: i32) -> (i32, i32) {
    %c0_i32 = arith.constant 0 : i32
    %c0_i32_0 = arith.constant 0 : i32
    %c0_i32_1 = arith.constant 0 : i32
    return %c0_i32, %c0_i32_0 : i32, i32
  }
  func.func @transform_15(%arg0: i32) -> (i32, i32, i32) {
    %c0_i32 = arith.constant 0 : i32
    %c0_i32_0 = arith.constant 0 : i32
    %c0_i32_1 = arith.constant 0 : i32
    %c0_i32_2 = arith.constant 0 : i32
    return %c0_i32, %c0_i32_0, %c0_i32_1 : i32, i32, i32
  }
  func.func @transform_16(%arg0: i32) -> (i32, i32) {
    %c0_i32 = arith.constant 0 : i32
    %c0_i32_0 = arith.constant 0 : i32
    %c0_i32_1 = arith.constant 0 : i32
    return %c0_i32, %c0_i32_0 : i32, i32
  }
  func.func @transform_17(%arg0: i32) -> (i32, i32, i32) {
    %c0_i32 = arith.constant 0 : i32
    %c0_i32_0 = arith.constant 0 : i32
    %c0_i32_1 = arith.constant 0 : i32
    return %arg0, %c0_i32, %c0_i32_0 : i32, i32, i32
  }
}

</mosaic_0001>

<bundles_post_ra>
// kernel: tpu_custom_call.1
= control target key start
LH: loop header
LB: loop body
LE: loop exit
PB: predicated region body
PF: predicated region fallthrough
CT: control target
= control target key end

     0   :  { %s3657_s0 = inlined_call_operand.vmem [shape: f32[2,16,4], index: 0, kind: input, shape index: {}]   ;;  %s3658_s1 = inlined_call_operand.hbm [shape: f32[1,4,8], index: 1, kind: input, shape index: {}]   ;;  %s3659_s2 = inlined_call_operand.hbm [shape: f32[1,8], index: 2, kind: input, shape index: {}]   ;;  %s3660_s3 = inlined_call_operand.vmem [shape: f32[3,8,16], index: 3, kind: input, shape index: {}]   ;;  %s3661_s4 = inlined_call_operand.hbm [shape: f32[1,16], index: 4, kind: input, shape index: {}]   ;;  %s3662_s5 = inlined_call_operand.vmem [shape: f32[3,16,16], index: 5, kind: input, shape index: {}]   ;;  %s3663_s6 = inlined_call_operand.hbm [shape: f32[1,16], index: 6, kind: input, shape index: {}]   ;;  %s3664_s7 = inlined_call_operand.hbm [shape: f32[1,8,16], index: 7, kind: input, shape index: {}]   ;;  %s3665_s8 = inlined_call_operand.hbm [shape: f32[1,16], index: 8, kind: input, shape index: {}]   ;;  %s3666_s9 = inlined_call_operand.hbm [shape: f32[3,16,16], index: 9, kind: input, shape index: {}]   ;;  %s3667_s10 = inlined_call_operand.vmem [shape: f32[1,16], index: 10, kind: input, shape index: {}]   ;;  %s3668_s11 = inlined_call_operand.hbm [shape: f32[3,16,16], index: 11, kind: input, shape index: {}]   ;;  %s3669_s12 = inlined_call_operand.vmem [shape: f32[1,16], index: 12, kind: input, shape index: {}]   ;;  %s3670_s13 = inlined_call_operand.hbm [shape: f32[1,16,16], index: 13, kind: input, shape index: {}]   ;;  %s3671_s14 = inlined_call_operand.vmem [shape: f32[1,16], index: 14, kind: input, shape index: {}]   ;;  %s3672_s15 = inlined_call_operand.vmem [shape: f32[1,16,8], index: 15, kind: input, shape index: {}]   ;;  %s3673_s16 = inlined_call_operand.vmem [shape: f32[1,8], index: 16, kind: input, shape index: {}]   ;;  %s3674_s17 = inlined_call_operand.hbm [shape: f32[2,8,8], index: 17, kind: output, shape index: {}]  }
   0x1   :  { %3688 = sst [smem:[#allocation31_spill]] %s3657_s0 }
   0x2   :  { %3689 = sst [smem:[#allocation32_spill]] %s3658_s1 }
   0x3   :  { %3690 = sst [smem:[#allocation33_spill]] %s3659_s2 }
   0x4   :  { %22 = vsyncpa [#allocation4], 0 }
   0x5   :  { %23 = vsyncpa [#allocation7], 0 }
   0x6   :  { %24 = vsyncpa [#allocation10], 0 }
   0x7   :  { %25 = vsyncpa [#allocation13], 0 }
   0x8   :  { %26 = vsyncpa [#allocation16], 0 }
   0x9   :  { %27 = vsyncpa [#allocation5], 0 }
   0xa   :  { %29 = vsyncpa [#allocation5 + $0x1], 0  ;;  %s3274_s24 = smov 0   ;;  %s3276_s25 = smov 0  }
   0xb   :  { %s3278_s26 = smov 0   ;;  %s3280_s27 = smov 0  }
   0xc LB: > { %3691 = sst [smem:[#allocation25_spill]] %s3156_s24  ;;  %s3295_s28 = sadd.s32 4294967295, %s3168_s27   ;;  %s3168_s27 = sphi %s3280_s27, %s3723_s27   ;;  %s3164_s26 = sphi %s3278_s26, %s3725_s26   ;;  %s3160_s25 = sphi %s3276_s25, %s3727_s25   ;;  %s3156_s24 = sphi %s3274_s24, %s3726_s24  }
   0xd   : > { %3692 = sst [smem:[#allocation26_spill]] %s3164_s26  ;;  %s2470_s29 = sadd.s32 4294967294, %s3168_s27  }
   0xe   : > { %3693 = sst [smem:[#allocation27_spill]] %s3168_s27  ;;  %s3299_s0 = sadd.s32 1, %s3168_s27  }
   0xf   : > { %3694 = sst [smem:[#allocation28_spill]] %s3299_s0  ;;  %s404_s30 = sadd.s32 1, %s3164_s26 }
  0x10   : > { %s401_s18 = ssub.s32 %s3168_s27, %s3299_s0  ;;  %p414_p0 = scmp.ne.s32.totalorder %s3164_s26, %s3160_s25 }
  0x11   : > { %p402_p1 = scmp.eq.s32.totalorder %s401_s18, 0  ;;  %p415_p2 = scmp.eq.s32.totalorder %s3295_s28, 1 }
  0x12   : > { %p420_p3 = scmp.ne.s32.totalorder %s3160_s25, %s3156_s24  ;;  %p421_p4 = scmp.eq.s32.totalorder %s2470_s29, 1 }
  0x13   : > { %s3310_s19 = scalar_select %p402_p1, %s3164_s26, %s404_s30  }
  0x14   : > { %p3312_p5 = por %p415_p2, %p414_p0  ;;  %p3316_p6 = por %p421_p4, %p420_p3 }
  0x15   : > { %3695 = sst [smem:[#allocation29_spill]] %s3310_s19  ;;  %p2471_p7 = scmp.ge.s32.totalorder %s3168_s27, 1 }
  0x16   : > { %s3696_s1 = scalar_select %p3312_p5, 1, 0 }
  0x17   : > { %s3697_s20 = scalar_select %p3316_p6, 1, 0 }
  0x18   : > { %p428_p8 = scmp.lt.s32.totalorder %s3168_s27, 3  ;;  %p3680_p9 = scmp.eq.s32.totalorder %s3295_s28, 0 }
  0x19   : > { %3698 = sst [smem:[#allocation30_spill]] %s3697_s20  ;;  %s3170_s22 = smov [#allocation6]  }
  0x1a   : > { %p3323_p10 = pnand %p2471_p7, %p428_p8  ;;  %s452_s23 = sshll.u32 %s3170_s22, 4  ;;  %s453_s23 = int_to_ptr.vmem [resolvable:$true] %s452_s23 }
  0x1b   : > { %s3171_s29 = smov [#allocation9]   ;;  %s3172_s19 = smov [#allocation12]  }
  0x1c   : > { %s3699_s21 = scalar_select %p3323_p10, 1, 0 }
  0x1d   : > { %p2744_p11 = pneg %p3323_p10  ;;  %s480_s30 = sshll.u32 %s3171_s29, 4  ;;  %s481_s30 = int_to_ptr.vmem [resolvable:$true] %s480_s30 }
  0x1e   : > { %s502_s26 = sshll.u32 %s3172_s19, 4  ;;  %s2865_s22 = scalar_lea.vmem %s453_s23, 16  ;;  %s3335_s26 = int_to_ptr.vmem [resolvable:$true] %s502_s26 }
  0x1f   : > { %p3331_p12 = pnand %p3680_p9, %p2744_p11  ;;  %p2866_p0 = scmp.ne.s32.totalorder %s453_s23, %s2865_s22 }
  0x20   : > { %s2872_s29 = scalar_lea.vmem %s453_s23, 32  ;;  %p2873_p3 = scmp.lt.s32.totalorder %s453_s23, %s453_s23 }
  0x21   : > { %p3339_p13 = pneg %p3331_p12  ;;  %p2874_p4 = scmp.lt.s32.totalorder %s2872_s29, %s2865_s22 }
  0x23   : > { %p2868_p1 = pnand %p2866_p0, %p3339_p13  ;;  %p2875_p7 = por %p2874_p4, %p2873_p3 }
  0x25   : > { %p2869_p2 = pneg %p2868_p1 }
  0x27   : > { %p2876_p8 = pnand %p2875_p7, %p2869_p2 }
  0x29   : > { %2879 = shalt.err (!%p2876_p8)
}
  0x2a   : > { %s3702_s2 = sld [smem:[#allocation33_spill]]  ;;  %s2891_s24 = scalar_lea.vmem %s481_s30, 16 }
  0x2b   : > { %p2892_p11 = scmp.ne.s32.totalorder %s481_s30, %s2891_s24  ;;  %s2898_s27 = scalar_lea.vmem %s481_s30, 32 }
  0x2c   : > { %p2899_p0 = scmp.lt.s32.totalorder %s481_s30, %s481_s30  ;;  %p2900_p1 = scmp.lt.s32.totalorder %s2898_s27, %s2891_s24 }
  0x2d   : > { %p2894_p9 = pnand %p2892_p11, %p3339_p13 }
  0x2e   : > { %p2901_p5 = por %p2900_p1, %p2899_p0 }
  0x2f   : > { %p2895_p6 = pneg %p2894_p9 }
  0x30   : > { %2750 = dma.hbm_to_vmem [thread:$0]  (!%p3331_p12), %s3702_s2, 16, %s453_s23, [#allocation7]  }
  0x31   : > { %p2902_p10 = pnand %p2901_p5, %p2895_p6 }
  0x33   : > { %2905 = shalt.err (!%p2902_p10)
}
  0x34   : > { %2756 = dma.hbm_to_vmem [thread:$0]  (!%p3331_p12), %s3663_s6, 16, %s481_s30, [#allocation10]  }
  0x35   : > { %s2917_s20 = scalar_lea.vmem %s3335_s26, 16  ;;  %s2924_s24 = scalar_lea.vmem %s3335_s26, 32 }
  0x36   : > { %p2918_p2 = scmp.ne.s32.totalorder %s3335_s26, %s2917_s20  ;;  %p2925_p5 = scmp.lt.s32.totalorder %s3335_s26, %s3335_s26 }
  0x37   : > { %p2926_p6 = scmp.lt.s32.totalorder %s2924_s24, %s2917_s20 }
  0x38   : > { %p2920_p9 = pnand %p2918_p2, %p3339_p13 }
  0x39   : > { %p2927_p10 = por %p2926_p6, %p2925_p5 }
  0x3a   : > { %p2921_p3 = pneg %p2920_p9 }
  0x3c   : > { %p2928_p4 = pnand %p2927_p10, %p2921_p3 }
  0x3e   : > { %2931 = shalt.err (!%p2928_p4)
}
  0x3f   : > { %2762 = dma.hbm_to_vmem [thread:$0]  (!%p3331_p12), %s3665_s8, 16, %s3335_s26, [#allocation13]  }
  0x40   : > { %s3173_s30 = smov [#allocation15]   ;;  %s3174_s22 = smov [#allocation3]  }
  0x41   : > { %s528_s19 = sshll.u32 %s3173_s30, 4  ;;  %s441_s29 = sshll.u32 %s3174_s22, 4  ;;  %s529_s19 = int_to_ptr.vmem [resolvable:$true] %s528_s19  ;;  %s442_s29 = int_to_ptr.vmem [resolvable:$true] %s441_s29 }
  0x42   : > { %s2943_s2 = scalar_lea.vmem %s529_s19, 768  ;;  %p2951_p0 = scmp.lt.s32.totalorder %s529_s19, %s529_s19 }
  0x43   : > { %p2944_p7 = scmp.ne.s32.totalorder %s529_s19, %s2943_s2  ;;  %p2952_p1 = scmp.lt.s32.totalorder %s2943_s2, %s2943_s2 }
  0x45   : > { %p2946_p8 = pnand %p2944_p7, %p3339_p13  ;;  %p2953_p2 = por %p2952_p1, %p2951_p0 }
  0x47   : > { %p2947_p11 = pneg %p2946_p8 }
  0x49   : > { %p2954_p9 = pnand %p2953_p2, %p2947_p11 }
  0x4b   : > { %2957 = shalt.err (!%p2954_p9)
}
  0x4c   : > { %s3684_s20 = smov 128   ;;  %s3686_s24 = smov 8  }
  0x4d   : > { %2768 = dma.hbm_to_vmem [thread:$0]  (!%p3331_p12), %s3668_s11, 768, %s529_s19, [#allocation16], %s3684_s20, %s3684_s20, %s3686_s24  }
  0x4e   : > { %s2969_s23 = scalar_lea.vmem %s442_s29, 64  ;;  %p2977_p10 = scmp.lt.s32.totalorder %s442_s29, %s442_s29 }
  0x4f   : > { %p2970_p3 = scmp.ne.s32.totalorder %s442_s29, %s2969_s23  ;;  %p2978_p4 = scmp.lt.s32.totalorder %s2969_s23, %s2969_s23 }
  0x51   : > { %p2972_p5 = pnand %p2970_p3, %p3339_p13  ;;  %p2979_p7 = por %p2978_p4, %p2977_p10 }
  0x53   : > { %p2973_p6 = pneg %p2972_p5 }
  0x55   : > { %p2980_p8 = pnand %p2979_p7, %p2973_p6 }
  0x57   : > { %2983 = shalt.err (!%p2980_p8)
}
  0x58   : > { %s3703_s22 = sld [smem:[#allocation32_spill]]  ;;  %s3177_s26 = smov [#allocation8]  }
  0x59   : > { %s466_s19 = sshll.u32 %s3177_s26, 4  ;;  %s3178_s27 = smov [#allocation11]   ;;  %s467_s19 = int_to_ptr.vmem [resolvable:$true] %s466_s19 }
  0x5a   : > { %s491_s20 = sshll.u32 %s3178_s27, 4  ;;  %s2995_s24 = scalar_lea.vmem %s467_s19, 16  ;;  %s492_s20 = int_to_ptr.vmem [resolvable:$true] %s491_s20 }
  0x5b   : > { %p2996_p11 = scmp.ne.s32.totalorder %s467_s19, %s2995_s24  ;;  %s3002_s23 = scalar_lea.vmem %s467_s19, 32 }
  0x5c   : > { %p3003_p2 = scmp.lt.s32.totalorder %s467_s19, %s467_s19  ;;  %p3004_p9 = scmp.lt.s32.totalorder %s3002_s23, %s2995_s24 }
  0x5d   : > { %p2998_p0 = pnand %p2996_p11, %p3339_p13 }
  0x5e   : > { %2747 = dma.hbm_to_vmem [thread:$0]  (!%p3331_p12), %s3703_s22, 64, %s442_s29, [#allocation4]  }
  0x5f   : > { %p2999_p1 = pneg %p2998_p0  ;;  %p3005_p3 = por %p3004_p9, %p3003_p2 }
  0x61   : > { %p3006_p5 = pnand %p3005_p3, %p2999_p1 }
  0x63   : > { %3009 = shalt.err (!%p3006_p5)
}
  0x64   : > { %2753 = dma.hbm_to_vmem [thread:$0]  (!%p3331_p12), %s3661_s4, 16, %s467_s19, [#allocation7]  }
  0x65   : > { %s3021_s30 = scalar_lea.vmem %s492_s20, 128  ;;  %p3029_p7 = scmp.lt.s32.totalorder %s492_s20, %s492_s20 }
  0x66   : > { %p3022_p6 = scmp.ne.s32.totalorder %s492_s20, %s3021_s30  ;;  %p3030_p8 = scmp.lt.s32.totalorder %s3021_s30, %s3021_s30 }
  0x68   : > { %p3024_p10 = pnand %p3022_p6, %p3339_p13  ;;  %p3031_p11 = por %p3030_p8, %p3029_p7 }
  0x6a   : > { %p3025_p4 = pneg %p3024_p10 }
  0x6c   : > { %p3032_p0 = pnand %p3031_p11, %p3025_p4 }
  0x6e   : > { %3035 = shalt.err (!%p3032_p0)
}
  0x6f   : > { %2759 = dma.hbm_to_vmem [thread:$0]  (!%p3331_p12), %s3664_s7, 128, %s492_s20, [#allocation10]  }
  0x70   : > { %s3179_s26 = smov [#allocation14]   ;;  %s3180_s27 = smov [#allocation17]  }
  0x71   : > { %s512_s19 = sshll.u32 %s3179_s26, 4  ;;  %s544_s23 = sshll.u32 %s3180_s27, 4  ;;  %s513_s19 = int_to_ptr.vmem [resolvable:$true] %s512_s19  ;;  %s545_s23 = int_to_ptr.vmem [resolvable:$true] %s544_s23 }
  0x72   : > { %s3047_s2 = scalar_lea.vmem %s513_s19, 768  ;;  %p3055_p3 = scmp.lt.s32.totalorder %s513_s19, %s513_s19 }
  0x73   : > { %p3048_p1 = scmp.ne.s32.totalorder %s513_s19, %s3047_s2  ;;  %p3056_p5 = scmp.lt.s32.totalorder %s3047_s2, %s3047_s2 }
  0x75   : > { %p3050_p2 = pnand %p3048_p1, %p3339_p13  ;;  %p3057_p6 = por %p3056_p5, %p3055_p3 }
  0x77   : > { %p3051_p9 = pneg %p3050_p2 }
  0x79   : > { %p3058_p10 = pnand %p3057_p6, %p3051_p9 }
  0x7b   : > { %3061 = shalt.err (!%p3058_p10)
}
  0x7c   : > { %s3704_s29 = smov 8   ;;  %s3705_s30 = smov 128  }
  0x7d   : > { %2765 = dma.hbm_to_vmem [thread:$0]  (!%p3331_p12), %s3666_s9, 768, %s513_s19, [#allocation13], %s3705_s30, %s3705_s30, %s3704_s29  }
  0x7e   : > { %s3073_s22 = scalar_lea.vmem %s545_s23, 256  ;;  %p3081_p11 = scmp.lt.s32.totalorder %s545_s23, %s545_s23 }
  0x7f   : > { %p3074_p4 = scmp.ne.s32.totalorder %s545_s23, %s3073_s22  ;;  %p3082_p0 = scmp.lt.s32.totalorder %s3073_s22, %s3073_s22 }
  0x81   : > { %p3076_p7 = pnand %p3074_p4, %p3339_p13  ;;  %p3083_p1 = por %p3082_p0, %p3081_p11 }
  0x83   : > { %p3077_p8 = pneg %p3076_p7 }
  0x85   : > { %p3084_p2 = pnand %p3083_p1, %p3077_p8 }
  0x87   : > { %3087 = shalt.err (!%p3084_p2)
}
  0x88   : > { %2771 = dma.hbm_to_vmem [thread:$0]  (!%p3331_p12), %s3670_s13, 256, %s545_s23, [#allocation16], %s3705_s30, %s3705_s30, %s3704_s29  }
  0x89   : > { %p3706_p9 = scmp.ne.s32.totalorder %s3699_s21, 0 }
  0x8a   : > { %p3707_p13 = scmp.eq.s32.totalorder (!%p3706_p9), %s3295_s28, 0 }
  0x8b   : > { %577 = sbr.rel (%p3706_p9) target bundleno = 1728 (0x6c0), region = 88 }
  0x90   : > { %3131 = dma.done.wait (%p3707_p13), [#allocation4], 64   ;;  %p3708_p3 = pmov %p3707_p13 }
  0x92   : > { %3133 = vsyncadd (%p3708_p3), [#allocation4], 4294967232  ;;  %p3709_p5 = pmov %p3708_p3 }
  0x93   : > { %p3710_p6 = pmov %p3708_p3 }
  0x94   : > { %3135 = dma.done.wait (%p3709_p5), [#allocation7], 32  }
  0x95   : > { %3137 = vsyncadd (%p3710_p6), [#allocation7], 4294967264  ;;  %p3711_p10 = pmov %p3708_p3 }
  0x96   : > { %p3712_p12 = pmov %p3708_p3 }
  0x97   : > { %3139 = dma.done.wait (%p3711_p10), [#allocation10], 144  }
  0x98   : > { %3141 = vsyncadd (%p3712_p12), [#allocation10], 4294967152  ;;  %p3713_p4 = pmov %p3708_p3 }
  0x99   : > { %p3714_p7 = pmov %p3708_p3 }
  0x9a   : > { %3143 = dma.done.wait (%p3713_p4), [#allocation13], 784  }
  0x9b   : > { %3145 = vsyncadd (%p3714_p7), [#allocation13], 4294966512  ;;  %p3715_p8 = pmov %p3708_p3 }
  0x9c   : > { %p3716_p11 = pmov %p3708_p3 }
  0x9d   : > { %3147 = dma.done.wait (%p3715_p8), [#allocation16], 1024  }
  0x9e   : > { %3149 = vsyncadd (%p3716_p11), [#allocation16], 4294966272  ;;  %p661_p0 = scmp.lt.s32.totalorder %s3295_s28, 1  ;;  %vm689_vm0 = vcmask 1043456   ;;  %s3717_s23 = sld [smem:[#allocation31_spill]]  ;;  %vm682_vm1 = vcmask 31744  }
  0x9f   : > { %v674_v0 = vld [vmem:[#allocation3] sm:$0xf]  ;;  %v2499_v10 = vld [vmem:[%s3660_s3 + $0x8] sm:$0xff]  ;;  %v3457_v11 = vld [vmem:[%s3660_s3 + $0x10] sm:$0xff]  ;;  %vm768_vm2 = vcmask 64512   ;;  %vm804_vm3 = vcmask 1040384  }
  0xa0   : > { %s662_s0 = scalar_select %p661_p0, %s3295_s28, 1  ;;  %2604 = vmatprep.subr.msk.mxu0 %vm689_vm0, %v674_v0  ;;  %v814_v9 = vld [vmem:[%s3660_s3] sm:$0xff]  ;;  %2609 = vmatprep.subr.mxu1 %v2499_v10  ;;  %vm819_vm4 = vcmask 1046528   ;;  %vm985_vm5 = vcmask 1045504   ;;  %vm1081_vm6 = vcmask 130048   ;;  %vm3182_vm7 = vmmov 0  }
  0xa1   : > { %2605 = vmatpush3.msk.msra.mxu0 %vm689_vm0, %v674_v0  ;;  %2610 = vmatpush3.msra.mxu1 %v2499_v10  ;;  %v2495_v12 = vld [vmem:[#allocation6] ss:$0 sm:$0xff]  ;;  %v1126_v0 = vld [vmem:[%s3662_s5 + $0x8] sm:$0xff]  ;;  %s658_s20 = sand.u32 1, %s3160_s25   ;;  %s2542_s27 = sshll.u32 %s3295_s28, 7 }
  0xa2   : > { %s2545_s21 = sshll.u32 %s662_s0, 4  ;;  %2614 = vmatprep.subr.mxu0 %v814_v9  ;;  %2619 = vmatprep.subr.mxu1 %v3457_v11  ;;  %s2492_s24 = sshll.u32 %s658_s20, 3 }
  0xa3   : > { %s660_s0 = scalar_lea.vmem [#allocation18], %s2492_s24  ;;  %p3718_p2 = scmp.ne.s32.totalorder %s3696_s1, 0 }
  0xa4   : > { %s665_s2 = scalar_lea.vmem %s3717_s23, %s2545_s21  ;;  %s2323_s21 = sshll.u32 %s660_s0, 4  ;;  %s2324_s21 = int_to_ptr.vmem [resolvable:$true] %s2323_s21 }
  0xa5   : > { %v666_v1 = vld [vmem:[%s665_s2] sm:$0xff]  ;;  %v667_v2 = vld [vmem:[%s665_s2 + $0x8] sm:$0xff]  ;;  %s3621_s23 = scalar_lea.hbm %s3674_s17, %s2542_s27  ;;  %s2310_s2 = scalar_lea.sflag [#allocation5], %s658_s20 }
  0xa6   : > { %v668_v3 = vadd.f32 1e-09, %v666_v1  ;;  %v669_v4 = vadd.f32 1e-09, %v667_v2  ;;  %v2509_v1 = vld [vmem:[%s3662_s5 + $0x18] sm:$0xff]  ;;  %v1125_v2 = vld [vmem:[%s3662_s5] sm:$0xff] }
  0xa7   : > { %s3088_s29 = scalar_lea.vmem %s2324_s21, 128  ;;  %s3183_s28 = smov [#allocation18]  }
  0xa8   : > { %2840 = vlog2.f32 %v668_v3  ;;  %v2508_v3 = vld [vmem:[%s3662_s5 + $0x10] sm:$0xff]  ;;  %p3089_p1 = scmp.ne.s32.totalorder %s2324_s21, %s3088_s29  ;;  %s3092_s30 = sshll.u32 %s3183_s28, 4  ;;  %s3093_s30 = int_to_ptr.vmem [resolvable:$false] %s3092_s30 }
  0xa9   : > { %2842 = vlog2.f32 %v669_v4  ;;  %v3501_v4 = vld [vmem:[%s3662_s5 + $0x28] sm:$0xff]  ;;  %s3094_s24 = scalar_lea.vmem %s3093_s30, 256  ;;  %p3095_p3 = scmp.lt.s32.totalorder %s2324_s21, %s3093_s30 }
  0xaa   : > { %p3090_p9 = pnand %p3089_p1, %p3718_p2  ;;  %p3096_p5 = scmp.lt.s32.totalorder %s3094_s24, %s3088_s29 }
  0xac   : > { %p3091_p13 = pneg %p3090_p9  ;;  %p3097_p6 = por %p3096_p5, %p3095_p3 }
  0xae   : > { %p3098_p10 = pnand %p3097_p6, %p3091_p13 }
  0xb5   : > { %v2841_v5 = vpop.eup %2840 }
  0xb6   : > { %v2843_v6 = vpop.eup %2842  ;;  %v671_v7 = vmul.f32 0.6931472, %v2841_v5  ;;  %v3503_v5 = vld [vmem:[#allocation11] sm:$0xff] }
  0xb7   : > { %v673_v8 = vmul.f32 0.6931472, %v2843_v6 }
  0xb8   : > { %2606 = vmatprep.mubr.msk.f32.mxu0 %vm682_vm1, %v671_v7 }
  0xb9   : > { %2607 = vmatmul.mubr.msk.f32.vlgmr.msra.gmra.mxu0 %vm682_vm1, %v673_v8 }
  0xba   : > { %2615 = vmatpush3.msra.mxu0 %v814_v9 }
  0xbb   : > { %2624 = vmatprep.subr.mxu0 %v2509_v1 }
 0x179   : > { %v2608_v13 = vpop.f32.mrf.mxu0 }
 0x17a   : > { %v765_v14 = vadd.f32 %v2608_v13, %v2495_v12 }
 0x17b   : > { %v759_v15 = vpop.f32.mrf.mxu0 }
 0x17c   : > { %v760_v16 = vadd.f32 %v2495_v12, %v759_v15  ;;  %v770_v17 = vsel %vm768_vm2, %v765_v14, 0.0  ;;  %v2507_v12 = vld [vmem:[#allocation8] ss:$0 sm:$0xff] }
 0x17e   : > { %v769_v18 = vsel %vm768_vm2, %v760_v16, 0.0 }
 0x17f   : > { %v771_v19 = vadd.f32 %v770_v17, %v769_v18 }
 0x181   : > { %v772_v20 = vrot.slane %v771_v19, 4 }
 0x183   : > { %v773_v21 = vadd.f32 %v772_v20, %v771_v19 }
 0x185   : > { %v774_v22 = vrot.slane %v773_v21, 2 }
 0x187   : > { %v775_v23 = vadd.f32 %v774_v22, %v773_v21 }
 0x189   : > { %v776_v24 = vrot.slane %v775_v23, 1 }
 0x18b   : > { %v777_v25 = vadd.f32 %v776_v24, %v775_v23 }
 0x18d   : > { %v779_v26 = vmul.f32 0.0625, %v777_v25 }
 0x18f   : > { %v780_v27 = vsub.f32 %v760_v16, %v779_v26  ;;  %v781_v28 = vsub.f32 %v765_v14, %v779_v26 }
 0x191   : > { %v782_v29 = vmul.f32 %v780_v27, %v780_v27  ;;  %v783_v30 = vmul.f32 %v781_v28, %v781_v28 }
 0x193   : > { %v784_v31 = vsel %vm768_vm2, %v782_v29, 0.0  ;;  %v785_v32 = vsel %vm768_vm2, %v783_v30, 0.0 }
 0x194   : > { %v786_v33 = vadd.f32 %v785_v32, %v784_v31 }
 0x196   : > { %v787_v34 = vrot.slane %v786_v33, 4 }
 0x198   : > { %v788_v35 = vadd.f32 %v787_v34, %v786_v33 }
 0x19a   : > { %v789_v36 = vrot.slane %v788_v35, 2 }
 0x19c   : > { %v790_v37 = vadd.f32 %v789_v36, %v788_v35 }
 0x19e   : > { %v791_v38 = vrot.slane %v790_v37, 1 }
 0x1a0   : > { %v792_v39 = vadd.f32 %v791_v38, %v790_v37 }
 0x1a2   : > { %v793_v40 = vmul.f32 0.0625, %v792_v39 }
 0x1a4   : > { %v794_v41 = vadd.f32 1e-05, %v793_v40 }
 0x1a6   : > { %2844 = vrsqrt.f32 %v794_v41 }
 0x1b3   : > { %v2845_v42 = vpop.eup %2844 }
 0x1b4   : > { %v796_v43 = vmul.f32 %v2845_v42, %v780_v27  ;;  %v797_v44 = vmul.f32 %v2845_v42, %v781_v28 }
 0x1b6   : > { %v3464_v45 = vmax.f32 %v796_v43, 0.0  ;;  %v3466_v46 = vmax.f32 %v797_v44, 0.0 }
 0x1b8   : > { %v801_v47 = vrot.slane %v3464_v45, 1  ;;  %v805_v48 = vrot.slane %v3464_v45, 7  ;;  %v806_v49 = vrot.slane %v3466_v46, 7  ;;  %v810_v50 = vrot.slane %v3466_v46, 5 }
 0x1ba   : > { %v812_v51 = vsel %vm804_vm3, %v801_v47, %v805_v48  ;;  %v807_v52 = vsel %vm804_vm3, %v805_v48, %v806_v49  ;;  %v813_v53 = vsel %vm804_vm3, %v806_v49, %v810_v50 }
 0x1bb   : > { %2616 = vmatprep.mubr.msk.f32.mxu0 %vm768_vm2, %v812_v51  ;;  %v986_v54 = vrot.slane %v812_v51, 2  ;;  %v820_v55 = vrot.slane %v812_v51, 1  ;;  %v821_v56 = vrot.slane %v807_v52, 1  ;;  %v823_v57 = vrot.slane %v813_v53, 1 }
 0x1bc   : > { %2617 = vmatmul.mubr.msk.f32.vlgmr.msra.gmra.mxu0 %vm768_vm2, %v807_v52  ;;  %v987_v58 = vrot.slane %v807_v52, 2  ;;  %v989_v61 = vrot.slane %v813_v53, 2 }
 0x1bd   : > { %v822_v59 = vsel %vm819_vm4, %v820_v55, %v821_v56  ;;  %v824_v60 = vsel %vm819_vm4, %v821_v56, %v823_v57  ;;  %2625 = vmatpush3.msra.mxu0 %v2509_v1  ;;  %v2514_v1 = vld [vmem:[%s3662_s5 + $0x20] sm:$0xff] }
 0x1be   : > { %2611 = vmatprep.mubr.msk.f32.mxu1 %vm768_vm2, %v822_v59  ;;  %v988_v62 = vsel %vm985_vm5, %v986_v54, %v987_v58  ;;  %v990_v63 = vsel %vm985_vm5, %v987_v58, %v989_v61  ;;  %2626 = vmatprep.subr.mxu0 %v2508_v3 }
 0x1bf   : > { %2612 = vmatmul.mubr.msk.f32.vlgmr.msra.gmra.mxu1 %vm768_vm2, %v824_v60  ;;  %2627 = vmatpush3.msra.mxu0 %v2508_v3 }
 0x1c0   : > { %2620 = vmatpush3.msra.mxu1 %v3457_v11  ;;  %2621 = vmatprep.mubr.msk.f32.mxu1 %vm768_vm2, %v988_v62 }
 0x1c1   : > { %2631 = vmatprep.subr.mxu1 %v1126_v0  ;;  %2638 = vmatprep.subr.mxu0 %v3501_v4 }
 0x1c3   : > { %2622 = vmatmul.mubr.msk.f32.vlgmr.msra.gmra.mxu1 %vm768_vm2, %v990_v63 }
 0x1c4   : > { %2632 = vmatpush3.msra.mxu1 %v1126_v0 }
 0x1c5   : > { %2633 = vmatprep.subr.mxu1 %v1125_v2 }
 0x1c6   : > { %2634 = vmatpush3.msra.mxu1 %v1125_v2 }
 0x1c7   : > { %2645 = vmatprep.subr.mxu1 %v3503_v5 }
 0x27c   : > { %v2618_v6 = vpop.f32.mrf.mxu0 }
 0x27e   : > { %v974_v10 = vpop.f32.mrf.mxu0 }
 0x27f   : > { %v2613_v7 = vpop.f32.mrf.mxu1 }
 0x280   : > { %v980_v9 = vadd.f32 %v2618_v6, %v2613_v7  ;;  %v1529_v6 = vld [vmem:[#allocation14 + $0x18] sm:$0xff]  ;;  %v1525_v7 = vld [vmem:[#allocation14] sm:$0xff] }
 0x281   : > { %v895_v8 = vpop.f32.mrf.mxu1 }
 0x282   : > { %v975_v13 = vadd.f32 %v974_v10, %v895_v8  ;;  %v3533_v8 = vld [vmem:[#allocation14 + $0x28] sm:$0xff] }
 0x283   : > { %v2623_v11 = vpop.f32.mrf.mxu1 }
 0x284   : > { %v1071_v14 = vadd.f32 %v2623_v11, %v980_v9 }
 0x285   : > { %v1061_v15 = vpop.f32.mrf.mxu1 }
 0x286   : > { %v1080_v16 = vadd.f32 %v2507_v12, %v1071_v14  ;;  %v1070_v17 = vadd.f32 %v1061_v15, %v975_v13  ;;  %v2518_v14 = vld [vmem:[#allocation9] ss:$0 sm:$0xff] }
 0x288   : > { %v1079_v18 = vadd.f32 %v2507_v12, %v1070_v17  ;;  %v1083_v19 = vsel %vm1081_vm6, %v1080_v16, 0.0 }
 0x28a   : > { %v1082_v20 = vsel %vm1081_vm6, %v1079_v18, 0.0 }
 0x28b   : > { %v1084_v21 = vadd.f32 %v1083_v19, %v1082_v20 }
 0x28d   : > { %v1085_v22 = vrot.slane %v1084_v21, 4 }
 0x28f   : > { %v1086_v23 = vadd.f32 %v1085_v22, %v1084_v21 }
 0x291   : > { %v1087_v24 = vrot.slane %v1086_v23, 2 }
 0x293   : > { %v1088_v25 = vadd.f32 %v1087_v24, %v1086_v23 }
 0x295   : > { %v1089_v26 = vrot.slane %v1088_v25, 1 }
 0x297   : > { %v1090_v27 = vadd.f32 %v1089_v26, %v1088_v25 }
 0x299   : > { %v1091_v28 = vmul.f32 0.0625, %v1090_v27 }
 0x29b   : > { %v1092_v29 = vsub.f32 %v1079_v18, %v1091_v28  ;;  %v1093_v30 = vsub.f32 %v1080_v16, %v1091_v28 }
 0x29d   : > { %v1094_v31 = vmul.f32 %v1092_v29, %v1092_v29  ;;  %v1095_v32 = vmul.f32 %v1093_v30, %v1093_v30 }
 0x29f   : > { %v1096_v33 = vsel %vm1081_vm6, %v1094_v31, 0.0  ;;  %v1097_v34 = vsel %vm1081_vm6, %v1095_v32, 0.0 }
 0x2a0   : > { %v1098_v35 = vadd.f32 %v1097_v34, %v1096_v33 }
 0x2a2   : > { %v1099_v36 = vrot.slane %v1098_v35, 4 }
 0x2a4   : > { %v1100_v37 = vadd.f32 %v1099_v36, %v1098_v35 }
 0x2a6   : > { %v1101_v38 = vrot.slane %v1100_v37, 2 }
 0x2a8   : > { %v1102_v39 = vadd.f32 %v1101_v38, %v1100_v37 }
 0x2aa   : > { %v1103_v40 = vrot.slane %v1102_v39, 1 }
 0x2ac   : > { %v1104_v41 = vadd.f32 %v1103_v40, %v1102_v39 }
 0x2ae   : > { %v1105_v42 = vmul.f32 0.0625, %v1104_v41 }
 0x2b0   : > { %v1106_v43 = vadd.f32 1e-05, %v1105_v42 }
 0x2b2   : > { %2846 = vrsqrt.f32 %v1106_v43 }
 0x2bf   : > { %v2847_v44 = vpop.eup %2846 }
 0x2c0   : > { %v1108_v47 = vmul.f32 %v2847_v44, %v1092_v29  ;;  %v1109_v48 = vmul.f32 %v2847_v44, %v1093_v30 }
 0x2c2   : > { %v1110_v49 = vmax.f32 %v1108_v47, 0.0  ;;  %v1111_v50 = vmax.f32 %v1109_v48, 0.0 }
 0x2c4   : > { %v1121_v51 = vrot.slane %v1111_v50, 5  ;;  %v1113_v52 = vrot.slane %v1110_v49, 1  ;;  %v1116_v53 = vrot.slane %v1110_v49, 7  ;;  %v1117_v54 = vrot.slane %v1111_v50, 7  ;;  %v2519_v50 = vld [vmem:[#allocation12] ss:$0 sm:$0xff] }
 0x2c6   : > { %v1123_v55 = vsel %vm804_vm3, %v1113_v52, %v1116_v53  ;;  %v1118_v56 = vsel %vm804_vm3, %v1116_v53, %v1117_v54  ;;  %v1124_v57 = vsel %vm804_vm3, %v1117_v54, %v1121_v51 }
 0x2c7   : > { %v1132_v58 = vrot.slane %v1123_v55, 1  ;;  %2635 = vmatprep.mubr.msk.f32.mxu1 %vm1081_vm6, %v1123_v55  ;;  %v1298_v59 = vrot.slane %v1123_v55, 2  ;;  %v1133_v60 = vrot.slane %v1118_v56, 1  ;;  %v1135_v61 = vrot.slane %v1124_v57, 1 }
 0x2c8   : > { %2636 = vmatmul.mubr.msk.f32.vlgmr.msra.gmra.mxu1 %vm1081_vm6, %v1118_v56  ;;  %v1299_v62 = vrot.slane %v1118_v56, 2  ;;  %v1301_v2 = vrot.slane %v1124_v57, 2 }
 0x2c9   : > { %2647 = vmatprep.mubr.msk.f32.mxu1 %vm768_vm2, %v3464_v45  ;;  %v1134_v63 = vsel %vm819_vm4, %v1132_v58, %v1133_v60  ;;  %v1136_v0 = vsel %vm819_vm4, %v1133_v60, %v1135_v61  ;;  %2646 = vmatpush3.msra.mxu1 %v3503_v5  ;;  %v1526_v5 = vld [vmem:[#allocation14 + $0x8] sm:$0xff] }
 0x2ca   : > { %2628 = vmatprep.mubr.msk.f32.mxu0 %vm1081_vm6, %v1134_v63  ;;  %v1300_v3 = vsel %vm985_vm5, %v1298_v59, %v1299_v62  ;;  %v1302_v45 = vsel %vm985_vm5, %v1299_v62, %v1301_v2  ;;  %2657 = vmatprep.subr.mxu1 %v1526_v5 }
 0x2cb   : > { %2629 = vmatmul.mubr.msk.f32.vlgmr.msra.gmra.mxu0 %vm1081_vm6, %v1136_v0 }
 0x2cc   : > { %2639 = vmatpush3.msra.mxu0 %v3501_v4  ;;  %2642 = vmatprep.mubr.msk.f32.mxu0 %vm1081_vm6, %v1300_v3  ;;  %v1528_v4 = vld [vmem:[#allocation14 + $0x10] sm:$0xff] }
 0x2cd   : > { %2640 = vmatprep.subr.mxu0 %v2514_v1  ;;  %2648 = vmatmul.mubr.msk.f32.vlgmr.msra.gmra.mxu1 %vm768_vm2, %v3466_v46 }
 0x2ce   : > { %2641 = vmatpush3.msra.mxu0 %v2514_v1  ;;  %2658 = vmatpush3.msra.mxu1 %v1526_v5 }
 0x2cf   : > { %2643 = vmatmul.mubr.msk.f32.vlgmr.msra.gmra.mxu0 %vm1081_vm6, %v1302_v45  ;;  %2650 = vmatprep.subr.mxu0 %v1529_v6 }
 0x2d0   : > { %2651 = vmatpush3.msra.mxu0 %v1529_v6  ;;  %2659 = vmatprep.subr.mxu1 %v1525_v7 }
 0x2d1   : > { %2660 = vmatpush3.msra.mxu1 %v1525_v7  ;;  %2652 = vmatprep.subr.mxu0 %v1528_v4 }
 0x2d2   : > { %2653 = vmatpush3.msra.mxu0 %v1528_v4 }
 0x2d3   : > { %2664 = vmatprep.subr.mxu0 %v3533_v8 }
 0x388   : > { %v2637_v46 = vpop.f32.mrf.mxu1 }
 0x38a   : > { %v1286_v12 = vpop.f32.mrf.mxu1 }
 0x38b   : > { %v2630_v9 = vpop.f32.mrf.mxu0 }
 0x38c   : > { %v1292_v11 = vadd.f32 %v2637_v46, %v2630_v9  ;;  %v1696_v9 = vld [vmem:[#allocation14 + $0x20] sm:$0xff] }
 0x38d   : > { %v1207_v10 = vpop.f32.mrf.mxu0  ;;  %v2649_v48 = vpop.f32.mrf.mxu1 }
 0x38e   : > { %v1287_v15 = vadd.f32 %v1286_v12, %v1207_v10  ;;  %v1507_v54 = vadd.f32 %v2649_v48, %v2519_v50 }
 0x38f   : > { %v2644_v13 = vpop.f32.mrf.mxu0  ;;  %v1501_v51 = vpop.f32.mrf.mxu1 }
 0x390   : > { %v1383_v16 = vadd.f32 %v2644_v13, %v1292_v11  ;;  %v1502_v55 = vadd.f32 %v2519_v50, %v1501_v51  ;;  %v1837_v13 = vld [vmem:[#allocation15 + $0x8] sm:$0xff] }
 0x391   : > { %v1373_v17 = vpop.f32.mrf.mxu0 }
 0x392   : > { %v1392_v18 = vadd.f32 %v2518_v14, %v1383_v16  ;;  %v1382_v19 = vadd.f32 %v1373_v17, %v1287_v15  ;;  %v1836_v15 = vld [vmem:[#allocation15] sm:$0xff]  ;;  %v1839_v16 = vld [vmem:[#allocation15 + $0x10] sm:$0xff]  ;;  %v3565_v17 = vld [vmem:[#allocation15 + $0x28] sm:$0xff] }
 0x394   : > { %v1391_v20 = vadd.f32 %v2518_v14, %v1382_v19  ;;  %v1394_v21 = vsel %vm1081_vm6, %v1392_v18, 0.0  ;;  %v1840_v14 = vld [vmem:[#allocation15 + $0x18] sm:$0xff] }
 0x395   : > { %2671 = vmatprep.subr.mxu1 %v1840_v14 }
 0x396   : > { %v1393_v22 = vsel %vm1081_vm6, %v1391_v20, 0.0 }
 0x397   : > { %v1395_v23 = vadd.f32 %v1394_v21, %v1393_v22 }
 0x399   : > { %v1396_v24 = vrot.slane %v1395_v23, 4 }
 0x39b   : > { %v1397_v25 = vadd.f32 %v1396_v24, %v1395_v23  ;;  %v2528_v24 = vld [vmem:[%s3667_s10] ss:$0 sm:$0xff] }
 0x39d   : > { %v1398_v26 = vrot.slane %v1397_v25, 2 }
 0x39f   : > { %v1399_v27 = vadd.f32 %v1398_v26, %v1397_v25 }
 0x3a1   : > { %v1400_v28 = vrot.slane %v1399_v27, 1 }
 0x3a3   : > { %v1401_v29 = vadd.f32 %v1400_v28, %v1399_v27 }
 0x3a5   : > { %v1402_v30 = vmul.f32 0.0625, %v1401_v29 }
 0x3a7   : > { %v1403_v31 = vsub.f32 %v1391_v20, %v1402_v30  ;;  %v1404_v32 = vsub.f32 %v1392_v18, %v1402_v30 }
 0x3a9   : > { %v1405_v33 = vmul.f32 %v1403_v31, %v1403_v31  ;;  %v1406_v34 = vmul.f32 %v1404_v32, %v1404_v32 }
 0x3ab   : > { %v1407_v35 = vsel %vm1081_vm6, %v1405_v33, 0.0  ;;  %v1408_v36 = vsel %vm1081_vm6, %v1406_v34, 0.0 }
 0x3ac   : > { %v1409_v37 = vadd.f32 %v1408_v36, %v1407_v35 }
 0x3ae   : > { %v1410_v38 = vrot.slane %v1409_v37, 4 }
 0x3b0   : > { %v1411_v39 = vadd.f32 %v1410_v38, %v1409_v37 }
 0x3b2   : > { %v1412_v40 = vrot.slane %v1411_v39, 2 }
 0x3b4   : > { %v1413_v41 = vadd.f32 %v1412_v40, %v1411_v39 }
 0x3b6   : > { %v1414_v42 = vrot.slane %v1413_v41, 1 }
 0x3b8   : > { %v1415_v43 = vadd.f32 %v1414_v42, %v1413_v41 }
 0x3ba   : > { %v1416_v44 = vmul.f32 0.0625, %v1415_v43 }
 0x3bc   : > { %v1417_v47 = vadd.f32 1e-05, %v1416_v44 }
 0x3be   : > { %2848 = vrsqrt.f32 %v1417_v47 }
 0x3cb   : > { %v2849_v49 = vpop.eup %2848 }
 0x3cc   : > { %v1419_v52 = vmul.f32 %v2849_v49, %v1403_v31  ;;  %v1420_v53 = vmul.f32 %v2849_v49, %v1404_v32 }
 0x3ce   : > { %v1421_v56 = vmax.f32 %v1419_v52, 0.0  ;;  %v1422_v57 = vmax.f32 %v1420_v53, 0.0 }
 0x3d0   : > { %v3540_v58 = vadd.f32 %v1502_v55, %v1421_v56  ;;  %v3542_v59 = vadd.f32 %v1507_v54, %v1422_v57 }
 0x3d2   : > { %v1513_v60 = vrot.slane %v3540_v58, 1  ;;  %v1516_v61 = vrot.slane %v3540_v58, 7  ;;  %v1517_v62 = vrot.slane %v3542_v59, 7  ;;  %v1521_v63 = vrot.slane %v3542_v59, 5 }
 0x3d4   : > { %v1523_v0 = vsel %vm804_vm3, %v1513_v60, %v1516_v61  ;;  %v1518_v1 = vsel %vm804_vm3, %v1516_v61, %v1517_v62  ;;  %v1524_v2 = vsel %vm804_vm3, %v1517_v62, %v1521_v63 }
 0x3d5   : > { %v1532_v3 = vrot.slane %v1523_v0, 1  ;;  %2661 = vmatprep.mubr.msk.f32.mxu1 %vm1081_vm6, %v1523_v0  ;;  %v1698_v45 = vrot.slane %v1523_v0, 2  ;;  %v1533_v5 = vrot.slane %v1518_v1, 1  ;;  %v1535_v6 = vrot.slane %v1524_v2, 1 }
 0x3d6   : > { %2662 = vmatmul.mubr.msk.f32.vlgmr.msra.gmra.mxu1 %vm1081_vm6, %v1518_v1  ;;  %v1699_v7 = vrot.slane %v1518_v1, 2  ;;  %v1701_v10 = vrot.slane %v1524_v2, 2 }
 0x3d7   : > { %v1534_v4 = vsel %vm819_vm4, %v1532_v3, %v1533_v5  ;;  %v1536_v46 = vsel %vm819_vm4, %v1533_v5, %v1535_v6  ;;  %2672 = vmatpush3.msra.mxu1 %v1840_v14 }
 0x3d8   : > { %2654 = vmatprep.mubr.msk.f32.mxu0 %vm1081_vm6, %v1534_v4  ;;  %v1700_v11 = vsel %vm985_vm5, %v1698_v45, %v1699_v7  ;;  %v1702_v12 = vsel %vm985_vm5, %v1699_v7, %v1701_v10  ;;  %2673 = vmatprep.subr.mxu1 %v1839_v16  ;;  %v2130_v10 = vld [vmem:[#allocation17] sm:$0xff] }
 0x3d9   : > { %2655 = vmatmul.mubr.msk.f32.vlgmr.msra.gmra.mxu0 %vm1081_vm6, %v1536_v46  ;;  %2674 = vmatpush3.msra.mxu1 %v1839_v16 }
 0x3da   : > { %2665 = vmatpush3.msra.mxu0 %v3533_v8  ;;  %2668 = vmatprep.mubr.msk.f32.mxu0 %vm1081_vm6, %v1700_v11  ;;  %v3562_v8 = vld [vmem:[#allocation17 + $0x8] sm:$0xff] }
 0x3db   : > { %2666 = vmatprep.subr.mxu0 %v1696_v9  ;;  %2685 = vmatprep.subr.mxu1 %v3565_v17 }
 0x3dc   : > { %2667 = vmatpush3.msra.mxu0 %v1696_v9 }
 0x3dd   : > { %2669 = vmatmul.mubr.msk.f32.vlgmr.msra.gmra.mxu0 %vm1081_vm6, %v1702_v12  ;;  %2678 = vmatprep.subr.mxu0 %v1837_v13 }
 0x3de   : > { %2679 = vmatpush3.msra.mxu0 %v1837_v13 }
 0x3df   : > { %2680 = vmatprep.subr.mxu0 %v1836_v15 }
 0x3e0   : > { %2681 = vmatpush3.msra.mxu0 %v1836_v15  ;;  %v2007_v15 = vld [vmem:[#allocation15 + $0x20] sm:$0xff] }
 0x3e1   : > { %2692 = vmatprep.subr.mxu0 %v3562_v8 }
 0x496   : > { %v2663_v18 = vpop.f32.mrf.mxu1 }
 0x498   : > { %v1686_v22 = vpop.f32.mrf.mxu1 }
 0x499   : > { %v2656_v19 = vpop.f32.mrf.mxu0 }
 0x49a   : > { %v1692_v21 = vadd.f32 %v2663_v18, %v2656_v19  ;;  %v3181_v19 = vmov 0.0  }
 0x49b   : > { %v1607_v20 = vpop.f32.mrf.mxu0 }
 0x49c   : > { %v1687_v25 = vadd.f32 %v1686_v22, %v1607_v20 }
 0x49d   : > { %v2670_v23 = vpop.f32.mrf.mxu0 }
 0x49e   : > { %v1783_v26 = vadd.f32 %v2670_v23, %v1692_v21 }
 0x49f   : > { %v1773_v27 = vpop.f32.mrf.mxu0 }
 0x4a0   : > { %v1792_v28 = vadd.f32 %v2528_v24, %v1783_v26  ;;  %v1782_v29 = vadd.f32 %v1773_v27, %v1687_v25  ;;  %v2535_v25 = vld [vmem:[%s3669_s12] ss:$0 sm:$0xff] }
 0x4a2   : > { %v1791_v30 = vadd.f32 %v2528_v24, %v1782_v29  ;;  %v1794_v31 = vsel %vm1081_vm6, %v1792_v28, 0.0 }
 0x4a4   : > { %v1793_v32 = vsel %vm1081_vm6, %v1791_v30, 0.0 }
 0x4a5   : > { %v1795_v33 = vadd.f32 %v1794_v31, %v1793_v32 }
 0x4a7   : > { %v1796_v34 = vrot.slane %v1795_v33, 4 }
 0x4a9   : > { %v1797_v35 = vadd.f32 %v1796_v34, %v1795_v33  ;;  %v2536_v33 = vld [vmem:[%s3671_s14] ss:$0 sm:$0xff] }
 0x4ab   : > { %v1798_v36 = vrot.slane %v1797_v35, 2 }
 0x4ad   : > { %v1799_v37 = vadd.f32 %v1798_v36, %v1797_v35 }
 0x4af   : > { %v1800_v38 = vrot.slane %v1799_v37, 1 }
 0x4b1   : > { %v1801_v39 = vadd.f32 %v1800_v38, %v1799_v37 }
 0x4b3   : > { %v1802_v40 = vmul.f32 0.0625, %v1801_v39 }
 0x4b5   : > { %v1803_v41 = vsub.f32 %v1791_v30, %v1802_v40  ;;  %v1804_v42 = vsub.f32 %v1792_v28, %v1802_v40 }
 0x4b7   : > { %v1805_v43 = vmul.f32 %v1803_v41, %v1803_v41  ;;  %v1806_v44 = vmul.f32 %v1804_v42, %v1804_v42 }
 0x4b9   : > { %v1807_v47 = vsel %vm1081_vm6, %v1805_v43, 0.0  ;;  %v1808_v48 = vsel %vm1081_vm6, %v1806_v44, 0.0 }
 0x4ba   : > { %v1809_v49 = vadd.f32 %v1808_v48, %v1807_v47 }
 0x4bc   : > { %v1810_v50 = vrot.slane %v1809_v49, 4 }
 0x4be   : > { %v1811_v51 = vadd.f32 %v1810_v50, %v1809_v49 }
 0x4c0   : > { %v1812_v52 = vrot.slane %v1811_v51, 2 }
 0x4c2   : > { %v1813_v53 = vadd.f32 %v1812_v52, %v1811_v51 }
 0x4c4   : > { %v1814_v54 = vrot.slane %v1813_v53, 1 }
 0x4c6   : > { %v1815_v55 = vadd.f32 %v1814_v54, %v1813_v53 }
 0x4c8   : > { %v1816_v56 = vmul.f32 0.0625, %v1815_v55 }
 0x4ca   : > { %v1817_v57 = vadd.f32 1e-05, %v1816_v56 }
 0x4cc   : > { %2850 = vrsqrt.f32 %v1817_v57 }
 0x4d9   : > { %v2851_v60 = vpop.eup %2850 }
 0x4da   : > { %v1819_v61 = vmul.f32 %v2851_v60, %v1803_v41  ;;  %v1820_v62 = vmul.f32 %v2851_v60, %v1804_v42 }
 0x4dc   : > { %v1821_v63 = vmax.f32 %v1819_v61, 0.0  ;;  %v1822_v0 = vmax.f32 %v1820_v62, 0.0 }
 0x4de   : > { %v1832_v1 = vrot.slane %v1822_v0, 5  ;;  %v1824_v2 = vrot.slane %v1821_v63, 1  ;;  %v1827_v3 = vrot.slane %v1821_v63, 7  ;;  %v1828_v45 = vrot.slane %v1822_v0, 7 }
 0x4e0   : > { %v1834_v5 = vsel %vm804_vm3, %v1824_v2, %v1827_v3  ;;  %v1829_v6 = vsel %vm804_vm3, %v1827_v3, %v1828_v45  ;;  %v1835_v7 = vsel %vm804_vm3, %v1828_v45, %v1832_v1 }
 0x4e1   : > { %v1843_v4 = vrot.slane %v1834_v5, 1  ;;  %2682 = vmatprep.mubr.msk.f32.mxu0 %vm1081_vm6, %v1834_v5  ;;  %v2009_v46 = vrot.slane %v1834_v5, 2  ;;  %v1844_v9 = vrot.slane %v1829_v6, 1  ;;  %v1846_v11 = vrot.slane %v1835_v7, 1  ;;  %v2539_v5 = vld [vmem:[%s3673_s16] ss:$0 sm:$0xff] }
 0x4e2   : > { %2683 = vmatmul.mubr.msk.f32.vlgmr.msra.gmra.mxu0 %vm1081_vm6, %v1829_v6  ;;  %v2010_v12 = vrot.slane %v1829_v6, 2  ;;  %v2012_v16 = vrot.slane %v1835_v7, 2 }
 0x4e3   : > { %2693 = vmatpush3.msra.mxu0 %v3562_v8  ;;  %2696 = vmatprep.mubr.msk.f32.mxu0 %vm1081_vm6, %v3540_v58  ;;  %v1845_v13 = vsel %vm819_vm4, %v1843_v4, %v1844_v9  ;;  %v1847_v14 = vsel %vm819_vm4, %v1844_v9, %v1846_v11  ;;  %v2227_v8 = vld [vmem:[%s3672_s15 + $0x8] sm:$0xff] }
 0x4e4   : > { %2675 = vmatprep.mubr.msk.f32.mxu1 %vm1081_vm6, %v1845_v13  ;;  %2694 = vmatprep.subr.mxu0 %v2130_v10  ;;  %v2011_v18 = vsel %vm985_vm5, %v2009_v46, %v2010_v12  ;;  %v2013_v58 = vsel %vm985_vm5, %v2010_v12, %v2012_v16 }
 0x4e5   : > { %2676 = vmatmul.mubr.msk.f32.vlgmr.msra.gmra.mxu1 %vm1081_vm6, %v1847_v14  ;;  %2695 = vmatpush3.msra.mxu0 %v2130_v10 }
 0x4e6   : > { %2686 = vmatpush3.msra.mxu1 %v3565_v17  ;;  %2689 = vmatprep.mubr.msk.f32.mxu1 %vm1081_vm6, %v2011_v18  ;;  %v2226_v17 = vld [vmem:[%s3672_s15] sm:$0xff] }
 0x4e7   : > { %2687 = vmatprep.subr.mxu1 %v2007_v15  ;;  %2697 = vmatmul.mubr.msk.f32.vlgmr.msra.gmra.mxu0 %vm1081_vm6, %v3542_v59 }
 0x4e8   : > { %2688 = vmatpush3.msra.mxu1 %v2007_v15 }
 0x4e9   : > { %2690 = vmatmul.mubr.msk.f32.vlgmr.msra.gmra.mxu1 %vm1081_vm6, %v2013_v58  ;;  %2699 = vmatprep.subr.mxu1 %v3181_v19 }
 0x4ea   : > { %2703 = vmatprep.mubr.msk.f32.mxu1 %vm3182_vm7, %v3181_v19  ;;  %2700 = vmatpush3.msra.mxu1 %v2227_v8 }
 0x4eb   : > { %2701 = vmatprep.subr.mxu1 %v3181_v19 }
 0x4ec   : > { %2702 = vmatpush3.msra.mxu1 %v2226_v17 }
 0x5a2   : > { %v2684_v59 = vpop.f32.mrf.mxu0 }
 0x5a4   : > { %v1997_v23 = vpop.f32.mrf.mxu0 }
 0x5a5   : > { %v2677_v20 = vpop.f32.mrf.mxu1 }
 0x5a6   : > { %v2003_v22 = vadd.f32 %v2684_v59, %v2677_v20 }
 0x5a7   : > { %v1918_v21 = vpop.f32.mrf.mxu1  ;;  %v2698_v32 = vpop.f32.mrf.mxu0 }
 0x5a8   : > { %v1998_v26 = vadd.f32 %v1997_v23, %v1918_v21  ;;  %v2215_v35 = vadd.f32 %v2698_v32, %v2536_v33 }
 0x5a9   : > { %v2691_v24 = vpop.f32.mrf.mxu1  ;;  %v2209_v34 = vpop.f32.mrf.mxu0 }
 0x5aa   : > { %v2094_v27 = vadd.f32 %v2691_v24, %v2003_v22  ;;  %v2210_v36 = vadd.f32 %v2536_v33, %v2209_v34 }
 0x5ab   : > { %v2084_v28 = vpop.f32.mrf.mxu1 }
 0x5ac   : > { %v2103_v29 = vadd.f32 %v2535_v25, %v2094_v27  ;;  %v2093_v30 = vadd.f32 %v2084_v28, %v1998_v26 }
 0x5ae   : > { %2105 = vst.msk [vmem:[#allocation2 + $0x8] sm:$0xff] %vm1081_vm6, %v2103_v29  ;;  %v2102_v31 = vadd.f32 %v2535_v25, %v2093_v30 }
 0x5b0   : > { %2104 = vst.msk [vmem:[#allocation2] sm:$0xff] %vm1081_vm6, %v2102_v31 }
 0x5b7   : > { %v2106_v37 = vld [vmem:[#allocation2] ss:$2 sm:$0xff] }
 0x5b8   : > { %v2107_v38 = vsel %vm1081_vm6, %v2106_v37, 0.0  ;;  %2218 = vst.msk [vmem:[#allocation2] sm:$0xff] %vm1081_vm6, %v2210_v36  ;;  %2219 = vst.msk [vmem:[#allocation2 + $0x8] sm:$0xff] %vm1081_vm6, %v2215_v35 }
 0x5b9   : > { %v2108_v39 = vrot.slane %v2107_v38, 4 }
 0x5bb   : > { %v2109_v40 = vadd.f32 %v2108_v39, %v2107_v38 }
 0x5bd   : > { %v2110_v41 = vrot.slane %v2109_v40, 2 }
 0x5bf   : > { %v2111_v42 = vadd.f32 %v2110_v41, %v2109_v40  ;;  %v2220_v61 = vld [vmem:[#allocation2] ss:$2 sm:$0xff]  ;;  %v2222_v62 = vld [vmem:[#allocation2 + $0x1] ss:$2 sm:$0xff] }
 0x5c0   : > { %v2223_v63 = vadd.f32 %v2222_v62, %v2220_v61 }
 0x5c1   : > { %v2112_v43 = vrot.slane %v2111_v42, 1 }
 0x5c2   : > { %v2224_v3 = vmul.f32 0.5, %v2223_v63 }
 0x5c3   : > { %v2113_v44 = vadd.f32 %v2112_v43, %v2111_v42 }
 0x5c5   : > { %v2115_v47 = vmul.f32 0.125, %v2113_v44 }
 0x5c7   : > { %v2116_v48 = vsub.f32 %v2106_v37, %v2115_v47 }
 0x5c9   : > { %v2117_v49 = vmul.f32 %v2116_v48, %v2116_v48 }
 0x5cb   : > { %v2118_v50 = vsel %vm1081_vm6, %v2117_v49, 0.0 }
 0x5cc   : > { %v2119_v51 = vrot.slane %v2118_v50, 4 }
 0x5ce   : > { %v2120_v52 = vadd.f32 %v2119_v51, %v2118_v50 }
 0x5d0   : > { %v2121_v53 = vrot.slane %v2120_v52, 2 }
 0x5d2   : > { %v2122_v54 = vadd.f32 %v2121_v53, %v2120_v52 }
 0x5d4   : > { %v2123_v55 = vrot.slane %v2122_v54, 1 }
 0x5d6   : > { %v2124_v56 = vadd.f32 %v2123_v55, %v2122_v54 }
 0x5d8   : > { %v2125_v57 = vmul.f32 0.125, %v2124_v56 }
 0x5da   : > { %v2126_v60 = vadd.f32 1e-05, %v2125_v57 }
 0x5dc   : > { %2852 = vrsqrt.f32 %v2126_v60 }
 0x5e9   : > { %v2853_v0 = vpop.eup %2852 }
 0x5ea   : > { %v2128_v1 = vmul.f32 %v2853_v0, %v2116_v48 }
 0x5ec   : > { %v2129_v2 = vmax.f32 %v2128_v1, 0.0 }
 0x5ee   : > { %v2225_v45 = vadd.f32 %v2224_v3, %v2129_v2 }
 0x5f0   : > { %2704 = vmatmul.mubr.msk.f32.vlgmr.msra.gmra.mxu1 %vm1081_vm6, %v2225_v45 }
 0x6b0   : > { %v2304_v6 = vpop.f32.mrf.mxu1 }
 0x6b1   : > { %v2305_v7 = vadd.f32 %v2539_v5, %v2304_v6 }
 0x6b2   : > { %v2705_v4 = vpop.f32.mrf.mxu1 }
 0x6b3   : > { %2308 = vst.msk [vmem:[%s660_s0] sm:$0xff] %vm768_vm2, %v2305_v7 }
 0x6b4   : > { %3101 = shalt.err (!%p3098_p10)
}
 0x6b5   : > { %s3102_s22 = scalar_lea.hbm %s3621_s23, 128  ;;  %s3106_s27 = scalar_lea.hbm %s3674_s17, 256 }
 0x6b6   : > { %p3103_p12 = scmp.ne.s32.totalorder %s3621_s23, %s3102_s22  ;;  %p3107_p8 = scmp.lt.s32.totalorder %s3621_s23, %s3674_s17 }
 0x6b7   : > { %p3108_p11 = scmp.lt.s32.totalorder %s3106_s27, %s3102_s22 }
 0x6b8   : > { %p3104_p4 = pnand %p3103_p12, %p3718_p2 }
 0x6b9   : > { %p3109_p0 = por %p3108_p11, %p3107_p8 }
 0x6ba   : > { %p3105_p7 = pneg %p3104_p4 }
 0x6bc   : > { %p3110_p1 = pnand %p3109_p0, %p3105_p7 }
 0x6be   : > { %3113 = shalt.err (!%p3110_p1)
}
 0x6bf   : > { %2742 = dma.vmem_to_hbm [thread:$0]  (%p3718_p2), %s2324_s21, 128, %s3621_s23, %s2310_s2  }
 0x6c0 PF: > { %s3719_s19 = sld [smem:[#allocation27_spill]] }
 0x6c1   : > { %s3720_s29 = sld [smem:[#allocation25_spill]] }
 0x6c2   : > { %s3721_s28 = sld [smem:[#allocation30_spill]] }
 0x6c6   : > { %p2794_p9 = scmp.ge.s32.totalorder %s3719_s19, 2 }
 0x6c7   : > { %s2335_s30 = sand.u32 1, %s3720_s29  }
 0x6c8   : > { %p3722_p13 = scmp.ne.s32.totalorder %s3721_s28, 0  ;;  %s2336_s24 = scalar_lea.sflag [#allocation5], %s2335_s30 }
 0x6ca   : > { %p2773_p3 = pnand %p2794_p9, %p3722_p13 }
 0x6cc   : > { %p2774_p5 = pneg %p2773_p3 }
 0x6ce   : > { %3151 = dma.done.wait (%p2774_p5), %s2336_s24, 128  }
 0x6cf   : > { %3153 = vsyncadd (%p2774_p5), %s2336_s24, 4294967168  ;;  %s3723_s27 = sld [smem:[#allocation28_spill]]  ;;  %s3726_s24 = smov %s3160_s25 }
 0x6d0   : > { %s3724_s22 = sld [smem:[#allocation26_spill]] }
 0x6d1   : > { %s3725_s26 = sld [smem:[#allocation29_spill]] }
 0x6d5   : > { %p32_p6 = scmp.ge.s32.totalorder %s3723_s27, 4  }
 0x6d6   : > { %s3727_s25 = smov %s3724_s22 }
 0x6d7   :  { %34 = sbr.rel (!%p32_p6) target bundleno = 12 (0xc), region = 169 }
 0x6dc   :  { %2341 = vsyncpa [#allocation4], 1 }
 0x6dd   :  { %2343 = vsyncpa [#allocation4 + $0x1], 1 }
 0x6de   :  { %2344 = vsyncpa [#allocation7], 1 }
 0x6df   :  { %2345 = vsyncpa [#allocation10], 1 }
 0x6e0   :  { %2346 = vsyncpa [#allocation13], 1 }
 0x6e1   :  { %2347 = vsyncpa [#allocation16], 1 }
 0x6e2   :  { %2348 = vsyncpa [#allocation5], 1 }
 0x6e3   :  { %2350 = vsyncpa [#allocation5 + $0x1], 1 }

</bundles_post_ra>
